<compile_context>
chip_gen: v7x
topology: tpu7x:2x2x1
jax: 0.10.0
libtpu: 0.0.40
codegen_flags: <defaults>
</compile_context>

<pallas_src>
import jax
import jax.numpy as jnp
from jax.experimental import pallas as pl
from jax.experimental.pallas import tpu as pltpu


def se_block_kernel(s_ref, w1_ref, b1_ref, x_ref, w2_ref, o_ref):
    # s_ref : [1, C_sq]   squeeze vector (x161)
    # w1_ref: [C, C_sq]   conv2d52 weight, stored orientation [Cout, Cin]
    # b1_ref: [C, 1]      conv2d52 bias
    # x_ref : [C, HW]     feature map (x159) in native NCHW, N=1
    # w2_ref: [C, C]      conv2d53 weight, stored orientation [Cout, Cin]
    # o_ref : [C, HW]
    s = jnp.maximum(s_ref[...], jnp.float32(0.0))                 # ReLU (VPU)

    # Gate: tiny matmul done as VPU mul + XLU lane-reduction (keeps the MXU
    # free and its latency off the critical path).
    z = jnp.sum(w1_ref[...] * s, axis=-1, keepdims=True) + b1_ref[...]   # [C, 1]
    g = pl.reciprocal(1.0 + jnp.exp(-z), approx=True)             # sigmoid (EUP)

    # Apply gate per channel (broadcast over the pixel/lane axis), then the
    # 1x1 conv as an MXU matmul with bf16 operands / f32 accumulation.
    xg = (x_ref[...] * g).astype(jnp.bfloat16)                    # [C, HW]
    w2 = w2_ref[...].astype(jnp.bfloat16)                         # [C, C]
    o_ref[...] = jnp.dot(
        w2, xg, preferred_element_type=jnp.float32
    ).astype(o_ref.dtype)


def se_block(x161, x159, w1, b1, w2):
    """x161: [N, C_sq, 1, 1], x159: [N, C, H, W] (NCHW, like PyTorch).
    w1: [C, C_sq, 1, 1], b1: [C], w2: [C, C, 1, 1]. Returns NCHW [N, C, H, W]."""
    N, C, H, W = x159.shape
    C_sq = x161.shape[1]
    assert N == 1  # TODO(synk): for N>1 add a grid over N (gate is per-image).

    # All of these are metadata-only reshapes (contiguous data) -> no HBM traffic.
    x = x159.reshape(C, H * W)
    s = x161.reshape(1, C_sq)
    w1m = w1.reshape(C, C_sq)       # [Cout, Cin], as stored
    b1m = b1.reshape(C, 1)
    w2m = w2.reshape(C, C)          # [Cout, Cin], as stored

    itemsize = 4
    cost = pl.CostEstimate(
        flops=2 * C * C * H * W + 2 * C * C_sq,
        transcendentals=2 * C,
        bytes_accessed=(2 * C * H * W + C * C + C * C_sq + 2 * C + C_sq) * itemsize,
    )

    out = pl.pallas_call(
        se_block_kernel,
        out_shape=jax.ShapeDtypeStruct((C, H * W), x159.dtype),
        in_specs=[pl.BlockSpec(memory_space=pltpu.MemorySpace.VMEM)] * 5,
        out_specs=pl.BlockSpec(memory_space=pltpu.MemorySpace.VMEM),
        cost_estimate=cost,
    )(s, w1m, b1m, x, w2m)

    return out.reshape(N, C, H, W)  # metadata-only reshape back to NCHW


def _reference(x161, x159, w1, b1, w2):
    """Pure-JAX f32 reference matching the PyTorch forward semantics."""
    s = jnp.maximum(x161, 0.0)[:, :, 0, 0]                        # [N, C_sq]
    gz = s @ jnp.transpose(w1[:, :, 0, 0]) + b1                   # [N, C]
    g = jax.nn.sigmoid(gz)[:, :, None, None]                      # [N, C, 1, 1]
    xg = g * x159                                                 # [N, C, H, W]
    return jnp.einsum("nchw,oc->nohw", xg, w2[:, :, 0, 0])


if __name__ == "__main__":
    key = jax.random.PRNGKey(0)
    k1, k2, k3, k4, k5 = jax.random.split(key, 5)

    N, C, H, W = 1, 336, 14, 14
    C_sq = 84

    x159 = jax.random.normal(k1, (N, C, H, W), dtype=jnp.float32)
    x161 = jax.random.normal(k2, (N, C_sq, 1, 1), dtype=jnp.float32)

    # deterministic synthetic parameters (shapes per the Conv2d definitions)
    w1 = 0.05 * jax.random.normal(k3, (C, C_sq, 1, 1), dtype=jnp.float32)  # conv2d52.weight
    b1 = 0.05 * jax.random.normal(k4, (C,), dtype=jnp.float32)             # conv2d52.bias
    w2 = 0.05 * jax.random.normal(k5, (C, C, 1, 1), dtype=jnp.float32)     # conv2d53.weight

    fn = jax.jit(se_block)
    out = jax.block_until_ready(fn(x161, x159, w1, b1, w2))

    ref = _reference(x161, x159, w1, b1, w2)
    assert out.shape == (N, C, H, W)
    # bf16 MXU operands + approx EUP reciprocal -> relaxed tolerance vs f32 ref
    # (worst-case abs deviation here is ~5e-3 on outputs of magnitude ~0.5).
    assert jnp.allclose(out, ref, atol=2e-2, rtol=2e-2), "mismatch vs reference"

    print("KERNEL_OK")
</pallas_src>

<mosaic_0001>
module attributes {stable_mosaic.version = 11 : i64} {
  func.func @se_block_kernel(%arg0: memref<1x84xf32, #tpu.memory_space<vmem>>, %arg1: memref<336x84xf32, #tpu.memory_space<vmem>>, %arg2: memref<336x1xf32, #tpu.memory_space<vmem>>, %arg3: memref<336x196xf32, #tpu.memory_space<vmem>>, %arg4: memref<336x336xf32, #tpu.memory_space<vmem>>, %arg5: memref<336x196xf32, #tpu.memory_space<vmem>>) attributes {dimension_semantics = [], scalar_prefetch = 0 : i64, scratch_operands = 0 : i64, tpu.core_type = #tpu.core_type<tc>} {
    %c0 = arith.constant 0 : index
    %c0_0 = arith.constant 0 : index
    %0 = vector.load %arg0[%c0, %c0_0] : memref<1x84xf32, #tpu.memory_space<vmem>>, vector<1x84xf32>
    %cst = arith.constant 0.000000e+00 : f32
    %1 = vector.broadcast %cst : f32 to vector<1x84xf32>
    %2 = arith.maximumf %0, %1 : vector<1x84xf32>
    %c0_1 = arith.constant 0 : index
    %c0_2 = arith.constant 0 : index
    %3 = vector.load %arg1[%c0_1, %c0_2] : memref<336x84xf32, #tpu.memory_space<vmem>>, vector<336x84xf32>
    %4 = vector.broadcast %2 : vector<1x84xf32> to vector<336x84xf32>
    %5 = arith.mulf %3, %4 : vector<336x84xf32>
    %cst_3 = arith.constant dense<0.000000e+00> : vector<336xf32>
    %6 = vector.multi_reduction <add>, %5, %cst_3 [1] : vector<336x84xf32> to vector<336xf32>
    %7 = vector.shape_cast %6 : vector<336xf32> to vector<336x1xf32>
    %c0_4 = arith.constant 0 : index
    %c0_5 = arith.constant 0 : index
    %8 = vector.load %arg2[%c0_4, %c0_5] : memref<336x1xf32, #tpu.memory_space<vmem>>, vector<336x1xf32>
    %9 = arith.addf %7, %8 : vector<336x1xf32>
    %cst_6 = arith.constant 0.000000e+00 : f32
    %10 = vector.broadcast %cst_6 : f32 to vector<336x1xf32>
    %11 = arith.subf %10, %9 : vector<336x1xf32>
    %12 = math.exp %11 : vector<336x1xf32>
    %cst_7 = arith.constant 1.000000e+00 : f32
    %13 = vector.broadcast %cst_7 : f32 to vector<336x1xf32>
    %14 = arith.addf %13, %12 : vector<336x1xf32>
    %15 = tpu.reciprocal %14 {approx = true} : vector<336x1xf32> -> vector<336x1xf32>
    %c0_8 = arith.constant 0 : index
    %c0_9 = arith.constant 0 : index
    %16 = vector.load %arg3[%c0_8, %c0_9] : memref<336x196xf32, #tpu.memory_space<vmem>>, vector<336x196xf32>
    %17 = vector.broadcast %15 : vector<336x1xf32> to vector<336x196xf32>
    %18 = arith.mulf %16, %17 : vector<336x196xf32>
    %19 = arith.truncf %18 : vector<336x196xf32> to vector<336x196xbf16>
    %c0_10 = arith.constant 0 : index
    %c0_11 = arith.constant 0 : index
    %20 = vector.load %arg4[%c0_10, %c0_11] : memref<336x336xf32, #tpu.memory_space<vmem>>, vector<336x336xf32>
    %21 = arith.truncf %20 : vector<336x336xf32> to vector<336x336xbf16>
    %cst_12 = arith.constant dense<0.000000e+00> : vector<336x196xf32>
    %22 = tpu.matmul %21, %19, %cst_12 {dimension_numbers = #tpu.dot_dimension_numbers<[1], [0], [0], [1], [0, 0, 1, 1], [], []>} : vector<336x336xbf16>, vector<336x196xbf16>, vector<336x196xf32> -> vector<336x196xf32>
    %c0_13 = arith.constant 0 : index
    %c0_14 = arith.constant 0 : index
    %23 = vector.load %arg5[%c0_13, %c0_14] : memref<336x196xf32, #tpu.memory_space<vmem>>, vector<336x196xf32>
    tpu.vector_store %arg5[%c0_13, %c0_14], %22 {strides = array<i32>} : memref<336x196xf32, #tpu.memory_space<vmem>>, vector<336x196xf32>,
    return
  }
}

</mosaic_0001>

<bundles_post_ra>
// kernel: se_block.1
= control target key start
LH: loop header
LB: loop body
LE: loop exit
PB: predicated region body
PF: predicated region fallthrough
CT: control target
= control target key end

     0   :  { %v66_v0 = vlaneseq  ;;  %vm113_vm0 = vcmask 687104   ;;  %vm1143_vm1 = vcmask 654336   ;;  %vm1694_vm2 = vcmask 556032   ;;  %s3446_s0 = inlined_call_operand.vmem [shape: f32[1,84], index: 0, kind: input, shape index: {}]   ;;  %s3447_s1 = inlined_call_operand.vmem [shape: f32[336,84], index: 1, kind: input, shape index: {}]   ;;  %s3448_s2 = inlined_call_operand.vmem [shape: f32[336,1], index: 2, kind: input, shape index: {}]   ;;  %s3449_s4 = inlined_call_operand.vmem [shape: f32[336,336], index: 4, kind: input, shape index: {}]   ;;  %s3450_s3 = inlined_call_operand.vmem [shape: f32[336,196], index: 3, kind: input, shape index: {}]   ;;  %s3451_s5 = inlined_call_operand.vmem [shape: f32[336,196], index: 5, kind: output, shape index: {}]  }
   0x1   :  { %v21_v1 = vld [vmem:[%s3446_s0] sm:$0x1]  ;;  %v25_v4 = vld [vmem:[%s3447_s1 + $0x10] sm:$0xff]  ;;  %v26_v7 = vld [vmem:[%s3447_s1 + $0x18] sm:$0xff] }
   0x2   :  { %v22_v2 = vmax.f32 %v21_v1, 0.0  ;;  %v67_v3 = vshrl.u32 %v66_v0, 7  ;;  %v23_v6 = vld [vmem:[%s3447_s1] sm:$0xff]  ;;  %v24_v8 = vld [vmem:[%s3447_s1 + $0x8] sm:$0xff]  ;;  %v30_v22 = vld [vmem:[%s3447_s1 + $0x38] sm:$0xff] }
   0x3   :  { %v28_v14 = vld [vmem:[%s3447_s1 + $0x28] sm:$0xff]  ;;  %v27_v15 = vld [vmem:[%s3447_s1 + $0x20] sm:$0xff]  ;;  %v29_v23 = vld [vmem:[%s3447_s1 + $0x30] sm:$0xff] }
   0x4   :  { %v68_v5 = vsub.s32 0, %v67_v3  ;;  %v32_v26 = vld [vmem:[%s3447_s1 + $0x48] sm:$0xff]  ;;  %v31_v29 = vld [vmem:[%s3447_s1 + $0x40] sm:$0xff]  ;;  %v34_v33 = vld [vmem:[%s3447_s1 + $0x58] sm:$0xff] }
   0x5   :  { %v60_v30 = vld [vmem:[%s3447_s1 + $0x128] sm:$0xff]  ;;  %v33_v37 = vld [vmem:[%s3447_s1 + $0x50] sm:$0xff]  ;;  %v62_v40 = vld [vmem:[%s3447_s1 + $0x138] sm:$0xff] }
   0x6   :  { %v2104_v9 = vrot.slane %v22_v2, %v68_v5  ;;  %v52_v31 = vld [vmem:[%s3447_s1 + $0xe8] sm:$0xff]  ;;  %v54_v41 = vld [vmem:[%s3447_s1 + $0xf8] sm:$0xff]  ;;  %v59_v44 = vld [vmem:[%s3447_s1 + $0x120] sm:$0xff] }
   0x7   :  { %v64_v42 = vld [vmem:[%s3447_s1 + $0x148] sm:$0xff]  ;;  %v51_v45 = vld [vmem:[%s3447_s1 + $0xe0] sm:$0xff]  ;;  %v61_v46 = vld [vmem:[%s3447_s1 + $0x130] sm:$0xff] }
   0x8   :  { %v73_v10 = vmul.f32 %v2104_v9, %v25_v4  ;;  %v71_v11 = vmul.f32 %v2104_v9, %v23_v6  ;;  %v74_v12 = vmul.f32 %v2104_v9, %v26_v7  ;;  %v72_v13 = vmul.f32 %v2104_v9, %v24_v8  ;;  %v36_v48 = vld [vmem:[%s3447_s1 + $0x68] sm:$0xff]  ;;  %v35_v55 = vld [vmem:[%s3447_s1 + $0x60] sm:$0xff]  ;;  %v53_v60 = vld [vmem:[%s3447_s1 + $0xf0] sm:$0xff] }
   0x9   :  { %v76_v20 = vmul.f32 %v2104_v9, %v28_v14  ;;  %v75_v21 = vmul.f32 %v2104_v9, %v27_v15  ;;  %v78_v25 = vmul.f32 %v2104_v9, %v30_v22  ;;  %v77_v28 = vmul.f32 %v2104_v9, %v29_v23  ;;  %v63_v61 = vld [vmem:[%s3447_s1 + $0x140] sm:$0xff] }
   0xa   :  { %v120_v16 = vsel %vm113_vm0, %v73_v10, 0.0  ;;  %v114_v17 = vsel %vm113_vm0, %v71_v11, 0.0  ;;  %v123_v18 = vsel %vm113_vm0, %v74_v12, 0.0  ;;  %v117_v19 = vsel %vm113_vm0, %v72_v13, 0.0  ;;  %v38_v11 = vld [vmem:[%s3447_s1 + $0x78] sm:$0xff]  ;;  %v37_v12 = vld [vmem:[%s3447_s1 + $0x70] sm:$0xff] }
   0xb   :  { %121 = vadd.xlane.f32.xlu1 %v120_v16  ;;  %115 = vadd.xlane.f32.xlu0 %v114_v17  ;;  %v129_v24 = vsel %vm113_vm0, %v76_v20, 0.0  ;;  %v126_v27 = vsel %vm113_vm0, %v75_v21, 0.0  ;;  %v80_v32 = vmul.f32 %v2104_v9, %v32_v26  ;;  %v135_v34 = vsel %vm113_vm0, %v78_v25, 0.0  ;;  %v39_v20 = vld [vmem:[%s3447_s1 + $0x80] sm:$0xff]  ;;  %v42_v25 = vld [vmem:[%s3447_s1 + $0x98] sm:$0xff]  ;;  %v41_v26 = vld [vmem:[%s3447_s1 + $0x90] sm:$0xff] }
   0xc   :  { %v132_v35 = vsel %vm113_vm0, %v77_v28, 0.0  ;;  %v79_v36 = vmul.f32 %v2104_v9, %v31_v29  ;;  %v108_v38 = vmul.f32 %v2104_v9, %v60_v30  ;;  %v100_v39 = vmul.f32 %v2104_v9, %v52_v31  ;;  %v44_v31 = vld [vmem:[%s3447_s1 + $0xa8] sm:$0xff] }
   0xd   :  { %v82_v43 = vmul.f32 %v2104_v9, %v34_v33  ;;  %v141_v47 = vsel %vm113_vm0, %v80_v32, 0.0  ;;  %v81_v52 = vmul.f32 %v2104_v9, %v33_v37  ;;  %v110_v53 = vmul.f32 %v2104_v9, %v62_v40  ;;  %v43_v32 = vld [vmem:[%s3447_s1 + $0xa0] sm:$0xff]  ;;  %v46_v37 = vld [vmem:[%s3447_s1 + $0xb8] sm:$0xff] }
   0xe   :  { %v2180_v49 = vsel %vm113_vm0, %v108_v38, 0.0  ;;  %v2183_v50 = vsel %vm113_vm0, %v100_v39, 0.0  ;;  %v138_v51 = vsel %vm113_vm0, %v79_v36, 0.0  ;;  %v102_v54 = vmul.f32 %v2104_v9, %v54_v41  ;;  %v45_v38 = vld [vmem:[%s3447_s1 + $0xb0] sm:$0xff] }
   0xf   :  { %124 = vadd.xlane.f32.xlu1 %v123_v18  ;;  %118 = vadd.xlane.f32.xlu0 %v117_v19  ;;  %v112_v56 = vmul.f32 %v2104_v9, %v64_v42  ;;  %v107_v57 = vmul.f32 %v2104_v9, %v59_v44  ;;  %v99_v58 = vmul.f32 %v2104_v9, %v51_v45  ;;  %v147_v62 = vsel %vm113_vm0, %v82_v43, 0.0  ;;  %v40_v19 = vld [vmem:[%s3447_s1 + $0x88] sm:$0xff]  ;;  %v55_v44 = vld [vmem:[%s3447_s1 + $0x100] sm:$0xff] }
  0x10   :  { %v109_v59 = vmul.f32 %v2104_v9, %v61_v46  ;;  %v84_v63 = vmul.f32 %v2104_v9, %v36_v48  ;;  %v2205_v0 = vsel %vm113_vm0, %v110_v53, 0.0  ;;  %v2208_v1 = vsel %vm113_vm0, %v102_v54, 0.0  ;;  %v56_v43 = vld [vmem:[%s3447_s1 + $0x108] sm:$0xff] }
  0x11   :  { %v2211_v2 = vsel %vm113_vm0, %v112_v56, 0.0  ;;  %v2214_v3 = vsel %vm113_vm0, %v107_v57, 0.0  ;;  %v2217_v4 = vsel %vm113_vm0, %v99_v58, 0.0  ;;  %v144_v6 = vsel %vm113_vm0, %v81_v52, 0.0  ;;  %v47_v52 = vld [vmem:[%s3447_s1 + $0xc0] sm:$0xff]  ;;  %v58_v58 = vld [vmem:[%s3447_s1 + $0x118] sm:$0xff] }
  0x12   :  { %v2220_v5 = vsel %vm113_vm0, %v109_v59, 0.0  ;;  %v83_v7 = vmul.f32 %v2104_v9, %v35_v55  ;;  %v101_v8 = vmul.f32 %v2104_v9, %v53_v60  ;;  %v111_v10 = vmul.f32 %v2104_v9, %v63_v61  ;;  %v57_v59 = vld [vmem:[%s3447_s1 + $0x110] sm:$0xff] }
  0x13   :  { %130 = vadd.xlane.f32.xlu1 %v129_v24  ;;  %127 = vadd.xlane.f32.xlu0 %v126_v27  ;;  %v153_v15 = vsel %vm113_vm0, %v84_v63, 0.0  ;;  %v86_v16 = vmul.f32 %v2104_v9, %v38_v11  ;;  %v85_v18 = vmul.f32 %v2104_v9, %v37_v12  ;;  %v88_v22 = vmul.f32 %v2104_v9, %v40_v19 }
  0x14   :  { %v2233_v13 = vsel %vm113_vm0, %v101_v8, 0.0  ;;  %v2236_v14 = vsel %vm113_vm0, %v111_v10, 0.0  ;;  %v150_v17 = vsel %vm113_vm0, %v83_v7, 0.0  ;;  %v87_v24 = vmul.f32 %v2104_v9, %v39_v20  ;;  %v49_v7 = vld [vmem:[%s3447_s1 + $0xd0] sm:$0xff] }
  0x15   :  { %v159_v21 = vsel %vm113_vm0, %v86_v16, 0.0  ;;  %v156_v23 = vsel %vm113_vm0, %v85_v18, 0.0  ;;  %v165_v27 = vsel %vm113_vm0, %v88_v22, 0.0  ;;  %v90_v28 = vmul.f32 %v2104_v9, %v42_v25  ;;  %v245_v22 = vld [vmem:[%s3448_s2 + $0x28] sm:$0xff] }
  0x16   :  { %v162_v29 = vsel %vm113_vm0, %v87_v24, 0.0  ;;  %v89_v30 = vmul.f32 %v2104_v9, %v41_v26  ;;  %v91_v36 = vmul.f32 %v2104_v9, %v43_v32  ;;  %v94_v40 = vmul.f32 %v2104_v9, %v46_v37  ;;  %v247_v32 = vld [vmem:[%s3448_s2 + $0x38] sm:$0xff] }
  0x17   :  { %136 = vadd.xlane.f32.xlu1 %v135_v34  ;;  %133 = vadd.xlane.f32.xlu0 %v132_v35  ;;  %v171_v33 = vsel %vm113_vm0, %v90_v28, 0.0  ;;  %v92_v34 = vmul.f32 %v2104_v9, %v44_v31  ;;  %v93_v42 = vmul.f32 %v2104_v9, %v45_v38  ;;  %v104_v46 = vmul.f32 %v2104_v9, %v56_v43  ;;  %v248_v43 = vld [vmem:[%s3448_s2 + $0x40] sm:$0xff] }
  0x18   :  { %v168_v35 = vsel %vm113_vm0, %v89_v30, 0.0  ;;  %v174_v41 = vsel %vm113_vm0, %v91_v36, 0.0  ;;  %v183_v45 = vsel %vm113_vm0, %v94_v40, 0.0  ;;  %v103_v48 = vmul.f32 %v2104_v9, %v55_v44 }
  0x19   :  { %v177_v39 = vsel %vm113_vm0, %v92_v34, 0.0  ;;  %v213_v53 = vsel %vm113_vm0, %v104_v46, 0.0  ;;  %v95_v56 = vmul.f32 %v2104_v9, %v47_v52  ;;  %v2058_v57 = vmov 0  }
  0x1a   :  { %v210_v55 = vsel %vm113_vm0, %v103_v48, 0.0  ;;  %1888 = vset.pattern.permute.xlu0 %v2058_v57  ;;  %1889 = vset.pattern.permute.xlu1 %v2058_v57  ;;  %v106_v61 = vmul.f32 %v2104_v9, %v58_v58  ;;  %v105_v63 = vmul.f32 %v2104_v9, %v57_v59  ;;  %v97_v12 = vmul.f32 %v2104_v9, %v49_v7 }
  0x1b   :  { %142 = vadd.xlane.f32.xlu1 %v141_v47  ;;  %139 = vadd.xlane.f32.xlu0 %v138_v51  ;;  %v180_v47 = vsel %vm113_vm0, %v93_v42, 0.0  ;;  %v48_v51 = vld [vmem:[%s3447_s1 + $0xc8] sm:$0xff] }
  0x1c   :  { %v96_v54 = vmul.f32 %v2104_v9, %v48_v51  ;;  %1482 = vmatprep.mubr.bf16.mxu0 %v2058_v57  ;;  %v219_v8 = vsel %vm113_vm0, %v106_v61, 0.0  ;;  %v216_v11 = vsel %vm113_vm0, %v105_v63, 0.0  ;;  %v192_v16 = vsel %vm113_vm0, %v97_v12, 0.0  ;;  %v249_v42 = vld [vmem:[%s3448_s2 + $0x48] sm:$0xff]  ;;  %v250_v61 = vld [vmem:[%s3448_s2 + $0x50] sm:$0xff] }
  0x1d   :  { %v253_v12 = vld [vmem:[%s3448_s2 + $0x68] sm:$0xff] }
  0x1e   :  { %v189_v60 = vsel %vm113_vm0, %v96_v54, 0.0 }
  0x1f   :  { %148 = vadd.xlane.f32.xlu1 %v147_v62  ;;  %145 = vadd.xlane.f32.xlu0 %v144_v6  ;;  %v186_v62 = vsel %vm113_vm0, %v95_v56, 0.0  ;;  %v50_v6 = vld [vmem:[%s3447_s1 + $0xd8] sm:$0xff] }
  0x20   :  { %v98_v10 = vmul.f32 %v2104_v9, %v50_v6  ;;  %v242_v9 = vld [vmem:[%s3448_s2 + $0x10] sm:$0xff] }
  0x23   :  { %154 = vadd.xlane.f32.xlu1 %v153_v15  ;;  %151 = vadd.xlane.f32.xlu0 %v150_v17  ;;  %v195_v15 = vsel %vm113_vm0, %v98_v10, 0.0 }
  0x27   :  { %160 = vadd.xlane.f32.xlu1 %v159_v21  ;;  %157 = vadd.xlane.f32.xlu0 %v156_v23  ;;  %v244_v23 = vld [vmem:[%s3448_s2 + $0x20] sm:$0xff] }
  0x2b   :  { %166 = vadd.xlane.f32.xlu1 %v165_v27  ;;  %163 = vadd.xlane.f32.xlu0 %v162_v29 }
  0x2f   :  { %172 = vadd.xlane.f32.xlu1 %v171_v33  ;;  %169 = vadd.xlane.f32.xlu0 %v168_v35  ;;  %v246_v33 = vld [vmem:[%s3448_s2 + $0x30] sm:$0xff] }
  0x33   :  { %178 = vadd.xlane.f32.xlu1 %v177_v39  ;;  %175 = vadd.xlane.f32.xlu0 %v174_v41 }
  0x37   :  { %184 = vadd.xlane.f32.xlu1 %v183_v45  ;;  %181 = vadd.xlane.f32.xlu0 %v180_v47 }
  0x3b   :  { %214 = vadd.xlane.f32.xlu1 %v213_v53  ;;  %211 = vadd.xlane.f32.xlu0 %v210_v55  ;;  %v251_v55 = vld [vmem:[%s3448_s2 + $0x58] sm:$0xff] }
  0x3f   :  { %190 = vadd.xlane.f32.xlu1 %v189_v60  ;;  %187 = vadd.xlane.f32.xlu0 %v186_v62 }
  0x43   :  { %220 = vadd.xlane.f32.xlu1 %v219_v8  ;;  %217 = vadd.xlane.f32.xlu0 %v216_v11 }
  0x47   :  { %196 = vadd.xlane.f32.xlu1 %v195_v15  ;;  %193 = vadd.xlane.f32.xlu0 %v192_v16 }
  0x4b   :  { %226 = vadd.xlane.f32.xlu1 %v2180_v49  ;;  %223 = vadd.xlane.f32.xlu0 %v2214_v3  ;;  %v240_v49 = vld [vmem:[%s3448_s2] sm:$0xff] }
  0x4f   :  { %202 = vadd.xlane.f32.xlu1 %v2183_v50  ;;  %199 = vadd.xlane.f32.xlu0 %v2217_v4 }
  0x53   :  { %232 = vadd.xlane.f32.xlu1 %v2205_v0  ;;  %229 = vadd.xlane.f32.xlu0 %v2220_v5 }
  0x57   :  { %208 = vadd.xlane.f32.xlu1 %v2208_v1  ;;  %205 = vadd.xlane.f32.xlu0 %v2233_v13  ;;  %v243_v1 = vld [vmem:[%s3448_s2 + $0x18] sm:$0xff] }
  0x5b   :  { %238 = vadd.xlane.f32.xlu1 %v2211_v2  ;;  %235 = vadd.xlane.f32.xlu0 %v2236_v14  ;;  %v241_v2 = vld [vmem:[%s3448_s2 + $0x8] sm:$0xff] }
  0x98   :  { %v122_v50 = vpop.xlane.xlu1 %121  ;;  %v116_v0 = vpop.xlane.xlu0 %115 }
  0x99   :  { %v284_v3 = vadd.f32 %v242_v9, %v122_v50  ;;  %v282_v4 = vadd.f32 %v240_v49, %v116_v0  ;;  %v252_v9 = vld [vmem:[%s3448_s2 + $0x60] sm:$0xff] }
  0x9b   :  { %v326_v5 = vsub.f32 0.0, %v284_v3  ;;  %v324_v13 = vsub.f32 0.0, %v282_v4 }
  0x9c   :  { %v125_v14 = vpop.xlane.xlu1 %124  ;;  %v119_v17 = vpop.xlane.xlu0 %118 }
  0x9d   :  { %v370_v18 = vmul.f32 1.442695, %v326_v5  ;;  %v366_v19 = vmul.f32 1.442695, %v324_v13  ;;  %v285_v20 = vadd.f32 %v243_v1, %v125_v14  ;;  %v283_v21 = vadd.f32 %v241_v2, %v119_v17 }
  0x9f   :  { %1890 = vpow2.f32 %v370_v18  ;;  %v327_v24 = vsub.f32 0.0, %v285_v20  ;;  %v325_v25 = vsub.f32 0.0, %v283_v21 }
  0xa0   :  { %1892 = vpow2.f32 %v366_v19  ;;  %v131_v26 = vpop.xlane.xlu1 %130  ;;  %v128_v27 = vpop.xlane.xlu0 %127  ;;  %v255_v19 = vld [vmem:[%s3448_s2 + $0x78] sm:$0xff] }
  0xa1   :  { %v372_v28 = vmul.f32 1.442695, %v327_v24  ;;  %v368_v29 = vmul.f32 1.442695, %v325_v25  ;;  %v287_v30 = vadd.f32 %v245_v22, %v131_v26  ;;  %v286_v31 = vadd.f32 %v244_v23, %v128_v27  ;;  %v254_v23 = vld [vmem:[%s3448_s2 + $0x70] sm:$0xff] }
  0xa3   :  { %1894 = vpow2.f32 %v372_v28  ;;  %v329_v34 = vsub.f32 0.0, %v287_v30  ;;  %v328_v35 = vsub.f32 0.0, %v286_v31 }
  0xa4   :  { %1896 = vpow2.f32 %v368_v29  ;;  %v137_v36 = vpop.xlane.xlu1 %136  ;;  %v134_v37 = vpop.xlane.xlu0 %133 }
  0xa5   :  { %v376_v38 = vmul.f32 1.442695, %v329_v34  ;;  %v289_v39 = vadd.f32 %v247_v32, %v137_v36  ;;  %v374_v40 = vmul.f32 1.442695, %v328_v35  ;;  %v288_v41 = vadd.f32 %v246_v33, %v134_v37  ;;  %v257_v32 = vld [vmem:[%s3448_s2 + $0x88] sm:$0xff]  ;;  %v256_v36 = vld [vmem:[%s3448_s2 + $0x80] sm:$0xff] }
  0xa7   :  { %1898 = vpow2.f32 %v376_v38  ;;  %v331_v44 = vsub.f32 0.0, %v289_v39  ;;  %v330_v45 = vsub.f32 0.0, %v288_v41 }
  0xa8   :  { %v143_v46 = vpop.xlane.xlu1 %142  ;;  %1900 = vpow2.f32 %v374_v40  ;;  %v140_v47 = vpop.xlane.xlu0 %139 }
  0xa9   :  { %v1891_v48 = vpop.eup %1890  ;;  %v380_v51 = vmul.f32 1.442695, %v331_v44  ;;  %v291_v52 = vadd.f32 %v249_v42, %v143_v46  ;;  %v290_v53 = vadd.f32 %v248_v43, %v140_v47  ;;  %v378_v56 = vmul.f32 1.442695, %v330_v45  ;;  %v259_v47 = vld [vmem:[%s3448_s2 + $0x98] sm:$0xff] }
  0xaa   :  { %v1893_v54 = vpop.eup %1892  ;;  %v452_v62 = vadd.f32 1.0, %v1891_v48 }
  0xab   :  { %v450_v58 = vadd.f32 1.0, %v1893_v54  ;;  %1902 = vpow2.f32 %v380_v51  ;;  %v333_v59 = vsub.f32 0.0, %v291_v52  ;;  %v332_v60 = vsub.f32 0.0, %v290_v53  ;;  %v258_v54 = vld [vmem:[%s3448_s2 + $0x90] sm:$0xff] }
  0xac   :  { %v149_v63 = vpop.xlane.xlu1 %148  ;;  %v146_v6 = vpop.xlane.xlu0 %145 }
  0xad   :  { %v1895_v7 = vpop.eup %1894  ;;  %1904 = vrcp.f32 %v450_v58  ;;  %v384_v8 = vmul.f32 1.442695, %v333_v59  ;;  %v293_v10 = vadd.f32 %v251_v55, %v149_v63  ;;  %v382_v15 = vmul.f32 1.442695, %v332_v60 }
  0xae   :  { %v1897_v11 = vpop.eup %1896  ;;  %1906 = vpow2.f32 %v378_v56  ;;  %v292_v16 = vadd.f32 %v250_v61, %v146_v6  ;;  %v453_v0 = vadd.f32 1.0, %v1895_v7 }
  0xaf   :  { %v451_v49 = vadd.f32 1.0, %v1897_v11  ;;  %1908 = vpow2.f32 %v384_v8  ;;  %v335_v50 = vsub.f32 0.0, %v293_v10  ;;  %v261_v8 = vld [vmem:[%s3448_s2 + $0xa8] sm:$0xff] }
  0xb0   :  { %1910 = vrcp.f32 %v452_v62  ;;  %v155_v3 = vpop.xlane.xlu1 %154  ;;  %v334_v4 = vsub.f32 0.0, %v292_v16  ;;  %v152_v1 = vpop.xlane.xlu0 %151  ;;  %v260_v16 = vld [vmem:[%s3448_s2 + $0xa0] sm:$0xff] }
  0xb1   :  { %v1899_v2 = vpop.eup %1898  ;;  %1912 = vrcp.f32 %v451_v49  ;;  %v388_v5 = vmul.f32 1.442695, %v335_v50  ;;  %v295_v13 = vadd.f32 %v253_v12, %v155_v3  ;;  %v294_v14 = vadd.f32 %v252_v9, %v152_v1 }
  0xb2   :  { %v1901_v17 = vpop.eup %1900  ;;  %v455_v18 = vadd.f32 1.0, %v1899_v2  ;;  %1914 = vpow2.f32 %v382_v15  ;;  %v386_v20 = vmul.f32 1.442695, %v334_v4 }
  0xb3   :  { %1916 = vpow2.f32 %v388_v5  ;;  %v337_v21 = vsub.f32 0.0, %v295_v13  ;;  %v336_v22 = vsub.f32 0.0, %v294_v14  ;;  %v454_v24 = vadd.f32 1.0, %v1901_v17  ;;  %v263_v14 = vld [vmem:[%s3448_s2 + $0xb8] sm:$0xff] }
  0xb4   :  { %1918 = vrcp.f32 %v453_v0  ;;  %v161_v25 = vpop.xlane.xlu1 %160  ;;  %v158_v26 = vpop.xlane.xlu0 %157 }
  0xb5   :  { %v1903_v27 = vpop.eup %1902  ;;  %1920 = vrcp.f32 %v455_v18  ;;  %v392_v28 = vmul.f32 1.442695, %v337_v21  ;;  %v297_v29 = vadd.f32 %v255_v19, %v161_v25  ;;  %v390_v30 = vmul.f32 1.442695, %v336_v22  ;;  %v262_v18 = vld [vmem:[%s3448_s2 + $0xb0] sm:$0xff] }
  0xb6   :  { %v457_v31 = vadd.f32 1.0, %v1903_v27  ;;  %1922 = vpow2.f32 %v386_v20  ;;  %v296_v33 = vadd.f32 %v254_v23, %v158_v26 }
  0xb7   :  { %v1905_v34 = vpop.eup %1904  ;;  %1924 = vpow2.f32 %v392_v28  ;;  %v339_v35 = vsub.f32 0.0, %v297_v29 }
  0xb8   :  { %v1907_v37 = vpop.eup %1906  ;;  %1926 = vrcp.f32 %v454_v24  ;;  %620 = vperm.xlu0 %1888, %v1905_v34   ;;  %v167_v38 = vpop.xlane.xlu1 %166  ;;  %v338_v39 = vsub.f32 0.0, %v296_v33 }
  0xb9   :  { %v164_v40 = vpop.xlane.xlu0 %163  ;;  %v1909_v41 = vpop.eup %1908  ;;  %v456_v42 = vadd.f32 1.0, %v1907_v37  ;;  %v396_v43 = vmul.f32 1.442695, %v339_v35  ;;  %v299_v44 = vadd.f32 %v257_v32, %v167_v38  ;;  %1928 = vpow2.f32 %v390_v30  ;;  %v273_v32 = vld [vmem:[%s3448_s2 + $0x108] sm:$0xff] }
  0xba   :  { %v1911_v45 = vpop.eup %1910  ;;  %1930 = vrcp.f32 %v457_v31  ;;  %v459_v46 = vadd.f32 1.0, %v1909_v41  ;;  %v394_v48 = vmul.f32 1.442695, %v338_v39  ;;  %v298_v51 = vadd.f32 %v256_v36, %v164_v40  ;;  %v272_v36 = vld [vmem:[%s3448_s2 + $0x100] sm:$0xff] }
  0xbb   :  { %v1913_v52 = vpop.eup %1912  ;;  %1932 = vrcp.f32 %v456_v42  ;;  %v341_v53 = vsub.f32 0.0, %v299_v44 }
  0xbc   :  { %v1915_v55 = vpop.eup %1914  ;;  %1934 = vrcp.f32 %v459_v46  ;;  %625 = vperm.xlu1 %1889, %v1913_v52   ;;  %v173_v56 = vpop.xlane.xlu1 %172  ;;  %v340_v58 = vsub.f32 0.0, %v298_v51 }
  0xbd   :  { %v170_v59 = vpop.xlane.xlu0 %169  ;;  %v1917_v60 = vpop.eup %1916  ;;  %1936 = vpow2.f32 %v396_v43  ;;  %v400_v61 = vmul.f32 1.442695, %v341_v53  ;;  %v458_v62 = vadd.f32 1.0, %v1915_v55  ;;  %v301_v63 = vadd.f32 %v259_v47, %v173_v56 }
  0xbe   :  { %v1919_v6 = vpop.eup %1918  ;;  %v461_v7 = vadd.f32 1.0, %v1917_v60  ;;  %1938 = vpow2.f32 %v394_v48  ;;  %v398_v10 = vmul.f32 1.442695, %v340_v58  ;;  %v300_v11 = vadd.f32 %v258_v54, %v170_v59  ;;  %v265_v48 = vld [vmem:[%s3448_s2 + $0xc8] sm:$0xff]  ;;  %v264_v54 = vld [vmem:[%s3448_s2 + $0xc0] sm:$0xff] }
  0xbf   :  { %v2400_v12 = vpop.eup %1920  ;;  %1940 = vpow2.f32 %v400_v61  ;;  %v343_v15 = vsub.f32 0.0, %v301_v63 }
  0xc0   :  { %v1923_v9 = vpop.eup %1922  ;;  %1942 = vrcp.f32 %v461_v7  ;;  %630 = vperm.xlu1 %1889, %v1911_v45   ;;  %v179_v49 = vpop.xlane.xlu1 %178  ;;  %v342_v50 = vsub.f32 0.0, %v300_v11 }
  0xc1   :  { %v176_v0 = vpop.xlane.xlu0 %175  ;;  %v1925_v3 = vpop.eup %1924  ;;  %1944 = vrcp.f32 %v458_v62  ;;  %v404_v4 = vmul.f32 1.442695, %v343_v15  ;;  %v460_v1 = vadd.f32 1.0, %v1923_v9  ;;  %v303_v2 = vadd.f32 %v261_v8, %v179_v49 }
  0xc2   :  { %v1927_v5 = vpop.eup %1926  ;;  %v463_v13 = vadd.f32 1.0, %v1925_v3  ;;  %1946 = vpow2.f32 %v398_v10  ;;  %v302_v17 = vadd.f32 %v260_v16, %v176_v0  ;;  %v402_v24 = vmul.f32 1.442695, %v342_v50  ;;  %v275_v10 = vld [vmem:[%s3448_s2 + $0x118] sm:$0xff]  ;;  %v274_v16 = vld [vmem:[%s3448_s2 + $0x110] sm:$0xff] }
  0xc3   :  { %v1929_v19 = vpop.eup %1928  ;;  %1948 = vpow2.f32 %v404_v4  ;;  %v345_v20 = vsub.f32 0.0, %v303_v2 }
  0xc4   :  { %v2411_v21 = vpop.eup %1930  ;;  %1950 = vrcp.f32 %v463_v13  ;;  %v462_v22 = vadd.f32 1.0, %v1929_v19  ;;  %635 = vperm.xlu1 %1889, %v1919_v6   ;;  %v185_v23 = vpop.xlane.xlu1 %184  ;;  %v344_v25 = vsub.f32 0.0, %v302_v17  ;;  %v267_v13 = vld [vmem:[%s3448_s2 + $0xd8] sm:$0xff] }
  0xc5   :  { %v182_v26 = vpop.xlane.xlu0 %181  ;;  %v1933_v27 = vpop.eup %1932  ;;  %1952 = vrcp.f32 %v460_v1  ;;  %v408_v28 = vmul.f32 1.442695, %v345_v20  ;;  %v305_v29 = vadd.f32 %v263_v14, %v185_v23 }
  0xc6   :  { %v304_v30 = vadd.f32 %v262_v18, %v182_v26  ;;  %v1935_v31 = vpop.eup %1934  ;;  %1954 = vrcp.f32 %v462_v22  ;;  %v406_v33 = vmul.f32 1.442695, %v344_v25 }
  0xc7   :  { %v1937_v34 = vpop.eup %1936  ;;  %1956 = vpow2.f32 %v408_v28  ;;  %v347_v35 = vsub.f32 0.0, %v305_v29  ;;  %665 = vperm.xlu0 %1888, %v1935_v31   ;;  %v277_v31 = vld [vmem:[%s3448_s2 + $0x128] sm:$0xff] }
  0xc8   :  { %v1939_v37 = vpop.eup %1938  ;;  %v465_v38 = vadd.f32 1.0, %v1937_v34  ;;  %640 = vperm.xlu1 %1889, %v1927_v5   ;;  %v215_v39 = vpop.xlane.xlu1 %214  ;;  %1958 = vpow2.f32 %v402_v24  ;;  %v346_v44 = vsub.f32 0.0, %v304_v30 }
  0xc9   :  { %v212_v40 = vpop.xlane.xlu0 %211  ;;  %v1941_v41 = vpop.eup %1940  ;;  %v412_v42 = vmul.f32 1.442695, %v347_v35  ;;  %v315_v43 = vadd.f32 %v273_v32, %v215_v39  ;;  %1960 = vpow2.f32 %v406_v33  ;;  %v464_v47 = vadd.f32 1.0, %v1939_v37 }
  0xca   :  { %v1943_v45 = vpop.eup %1942  ;;  %1962 = vrcp.f32 %v465_v38  ;;  %v467_v46 = vadd.f32 1.0, %v1941_v41  ;;  %v314_v51 = vadd.f32 %v272_v36, %v212_v40  ;;  %v410_v62 = vmul.f32 1.442695, %v346_v44  ;;  %v269_v44 = vld [vmem:[%s3448_s2 + $0xe8] sm:$0xff] }
  0xcb   :  { %v2422_v52 = vpop.eup %1944  ;;  %1964 = vpow2.f32 %v412_v42  ;;  %v357_v53 = vsub.f32 0.0, %v315_v43  ;;  %675 = vperm.xlu0 %1888, %v1943_v45  }
  0xcc   :  { %v1947_v55 = vpop.eup %1946  ;;  %1966 = vrcp.f32 %v467_v46  ;;  %645 = vperm.xlu1 %1889, %v2400_v12   ;;  %v191_v56 = vpop.xlane.xlu1 %190  ;;  %v356_v63 = vsub.f32 0.0, %v314_v51  ;;  %v276_v46 = vld [vmem:[%s3448_s2 + $0x120] sm:$0xff] }
  0xcd   :  { %v188_v58 = vpop.xlane.xlu0 %187  ;;  %v1949_v59 = vpop.eup %1948  ;;  %v432_v60 = vmul.f32 1.442695, %v357_v53  ;;  %v307_v61 = vadd.f32 %v265_v48, %v191_v56  ;;  %1968 = vrcp.f32 %v464_v47  ;;  %v466_v8 = vadd.f32 1.0, %v1947_v55  ;;  %v268_v51 = vld [vmem:[%s3448_s2 + $0xe0] sm:$0xff] }
  0xce   :  { %v1951_v6 = vpop.eup %1950  ;;  %v469_v7 = vadd.f32 1.0, %v1949_v59  ;;  %v306_v11 = vadd.f32 %v264_v54, %v188_v58  ;;  %v430_v1 = vmul.f32 1.442695, %v356_v63 }
  0xcf   :  { %v2431_v15 = vpop.eup %1952  ;;  %1970 = vpow2.f32 %v432_v60  ;;  %v349_v12 = vsub.f32 0.0, %v307_v61  ;;  %685 = vperm.xlu0 %1888, %v1951_v6   ;;  %v279_v6 = vld [vmem:[%s3448_s2 + $0x138] sm:$0xff] }
  0xd0   :  { %v2436_v9 = vpop.eup %1954  ;;  %1972 = vrcp.f32 %v469_v7  ;;  %650 = vperm.xlu1 %1889, %v1933_v27   ;;  %v221_v49 = vpop.xlane.xlu1 %220  ;;  %v348_v14 = vsub.f32 0.0, %v306_v11 }
  0xd1   :  { %v218_v50 = vpop.xlane.xlu0 %217  ;;  %v1957_v0 = vpop.eup %1956  ;;  %v416_v3 = vmul.f32 1.442695, %v349_v12  ;;  %v317_v4 = vadd.f32 %v275_v10, %v221_v49  ;;  %1974 = vpow2.f32 %v410_v62 }
  0xd2   :  { %v1959_v2 = vpop.eup %1958  ;;  %v471_v5 = vadd.f32 1.0, %v1957_v0  ;;  %1976 = vrcp.f32 %v466_v8  ;;  %v316_v17 = vadd.f32 %v274_v16, %v218_v50  ;;  %v414_v32 = vmul.f32 1.442695, %v348_v14 }
  0xd3   :  { %v1961_v18 = vpop.eup %1960  ;;  %1978 = vpow2.f32 %v416_v3  ;;  %v468_v19 = vadd.f32 1.0, %v1959_v2  ;;  %v359_v20 = vsub.f32 0.0, %v317_v4 }
  0xd4   :  { %v1963_v22 = vpop.eup %1962  ;;  %1980 = vrcp.f32 %v471_v5  ;;  %655 = vperm.xlu1 %1889, %v2411_v21   ;;  %v197_v23 = vpop.xlane.xlu1 %196  ;;  %v470_v27 = vadd.f32 1.0, %v1961_v18  ;;  %v358_v33 = vsub.f32 0.0, %v316_v17  ;;  %v266_v21 = vld [vmem:[%s3448_s2 + $0xd0] sm:$0xff]  ;;  %v271_v5 = vld [vmem:[%s3448_s2 + $0xf8] sm:$0xff] }
  0xd5   :  { %v194_v24 = vpop.xlane.xlu0 %193  ;;  %v1965_v25 = vpop.eup %1964  ;;  %v436_v26 = vmul.f32 1.442695, %v359_v20  ;;  %695 = vperm.xlu0 %1888, %v1963_v22   ;;  %v309_v28 = vadd.f32 %v267_v13, %v197_v23  ;;  %1982 = vpow2.f32 %v430_v1  ;;  %v278_v17 = vld [vmem:[%s3448_s2 + $0x130] sm:$0xff] }
  0xd6   :  { %v1967_v29 = vpop.eup %1966  ;;  %v473_v30 = vadd.f32 1.0, %v1965_v25  ;;  %1984 = vrcp.f32 %v468_v19  ;;  %v308_v41 = vadd.f32 %v266_v21, %v194_v24  ;;  %v434_v45 = vmul.f32 1.442695, %v358_v33 }
  0xd7   :  { %1986 = vpow2.f32 %v436_v26  ;;  %v351_v34 = vsub.f32 0.0, %v309_v28  ;;  %v2448_v35 = vpop.eup %1968  ;;  %v281_v28 = vld [vmem:[%s3448_s2 + $0x148] sm:$0xff] }
  0xd8   :  { %1988 = vrcp.f32 %v473_v30  ;;  %660 = vperm.xlu1 %1889, %v2422_v52   ;;  %v227_v36 = vpop.xlane.xlu1 %226  ;;  %v350_v59 = vsub.f32 0.0, %v308_v41 }
  0xd9   :  { %v224_v37 = vpop.xlane.xlu0 %223  ;;  %v1971_v38 = vpop.eup %1970  ;;  %1990 = vrcp.f32 %v470_v27  ;;  %v420_v39 = vmul.f32 1.442695, %v351_v34  ;;  %705 = vperm.xlu0 %1888, %v1967_v29   ;;  %v319_v40 = vadd.f32 %v277_v31, %v227_v36 }
  0xda   :  { %v1973_v42 = vpop.eup %1972  ;;  %v483_v43 = vadd.f32 1.0, %v1971_v38  ;;  %1992 = vpow2.f32 %v414_v32  ;;  %v318_v60 = vadd.f32 %v276_v46, %v224_v37  ;;  %v418_v0 = vmul.f32 1.442695, %v350_v59  ;;  %v270_v32 = vld [vmem:[%s3448_s2 + $0xf0] sm:$0xff] }
  0xdb   :  { %v1975_v47 = vpop.eup %1974  ;;  %1994 = vpow2.f32 %v420_v39  ;;  %v361_v48 = vsub.f32 0.0, %v319_v40 }
  0xdc   :  { %v1977_v52 = vpop.eup %1976  ;;  %1996 = vrcp.f32 %v483_v43  ;;  %670 = vperm.xlu1 %1889, %v2431_v15   ;;  %v203_v53 = vpop.xlane.xlu1 %202  ;;  %v472_v63 = vadd.f32 1.0, %v1975_v47  ;;  %v360_v3 = vsub.f32 0.0, %v318_v60  ;;  %v280_v43 = vld [vmem:[%s3448_s2 + $0x140] sm:$0xff] }
  0xdd   :  { %v200_v54 = vpop.xlane.xlu0 %199  ;;  %v1979_v55 = vpop.eup %1978  ;;  %v440_v56 = vmul.f32 1.442695, %v361_v48  ;;  %715 = vperm.xlu0 %1888, %v1973_v42   ;;  %v311_v58 = vadd.f32 %v269_v44, %v203_v53  ;;  %1998 = vpow2.f32 %v434_v45 }
  0xde   :  { %v1981_v61 = vpop.eup %1980  ;;  %v475_v62 = vadd.f32 1.0, %v1979_v55  ;;  %v310_v7 = vadd.f32 %v268_v51, %v200_v54  ;;  %v438_v24 = vmul.f32 1.442695, %v360_v3 }
  0xdf   :  { %v1983_v8 = vpop.eup %1982  ;;  %2000 = vpow2.f32 %v440_v56  ;;  %v353_v10 = vsub.f32 0.0, %v311_v58 }
  0xe0   :  { %v1985_v11 = vpop.eup %1984  ;;  %2002 = vrcp.f32 %v475_v62  ;;  %680 = vperm.xlu1 %1889, %v2436_v9   ;;  %v233_v15 = vpop.xlane.xlu1 %232  ;;  %v482_v2 = vadd.f32 1.0, %v1983_v8  ;;  %v352_v13 = vsub.f32 0.0, %v310_v7 }
  0xe1   :  { %v230_v12 = vpop.xlane.xlu0 %229  ;;  %v1987_v16 = vpop.eup %1986  ;;  %v424_v49 = vmul.f32 1.442695, %v353_v10  ;;  %725 = vperm.xlu0 %1888, %v1981_v61   ;;  %v321_v50 = vadd.f32 %v279_v6, %v233_v15  ;;  %2004 = vrcp.f32 %v472_v63 }
  0xe2   :  { %v1989_v4 = vpop.eup %1988  ;;  %v485_v1 = vadd.f32 1.0, %v1987_v16  ;;  %v422_v29 = vmul.f32 1.442695, %v352_v13  ;;  %v320_v30 = vadd.f32 %v278_v17, %v230_v12 }
  0xe3   :  { %v1991_v14 = vpop.eup %1990  ;;  %2006 = vpow2.f32 %v424_v49  ;;  %v363_v9 = vsub.f32 0.0, %v321_v50 }
  0xe4   :  { %v1993_v18 = vpop.eup %1992  ;;  %2008 = vrcp.f32 %v485_v1  ;;  %690 = vperm.xlu1 %1889, %v2448_v35   ;;  %v209_v19 = vpop.xlane.xlu1 %208  ;;  %v362_v40 = vsub.f32 0.0, %v320_v30 }
  0xe5   :  { %v1995_v20 = vpop.eup %1994  ;;  %v444_v22 = vmul.f32 1.442695, %v363_v9  ;;  %735 = vperm.xlu0 %1888, %v1989_v4   ;;  %v313_v23 = vadd.f32 %v271_v5, %v209_v19  ;;  %2010 = vpow2.f32 %v418_v0  ;;  %v206_v25 = vpop.xlane.xlu0 %205  ;;  %v474_v35 = vadd.f32 1.0, %v1993_v18 }
  0xe6   :  { %v1997_v26 = vpop.eup %1996  ;;  %v477_v27 = vadd.f32 1.0, %v1995_v20  ;;  %2012 = vrcp.f32 %v482_v2  ;;  %v312_v41 = vadd.f32 %v270_v32, %v206_v25  ;;  %v535_v32 = vld [vmem:[%s3450_s3 + $0x8] sm:$0xff] }
  0xe7   :  { %2014 = vpow2.f32 %v444_v22  ;;  %v355_v31 = vsub.f32 0.0, %v313_v23  ;;  %v1999_v33 = vpop.eup %1998 }
  0xe8   :  { %2016 = vrcp.f32 %v477_v27  ;;  %700 = vperm.xlu1 %1889, %v1977_v52   ;;  %v239_v21 = vpop.xlane.xlu1 %238  ;;  %v442_v52 = vmul.f32 1.442695, %v362_v40  ;;  %v354_v53 = vsub.f32 0.0, %v312_v41  ;;  %v484_v56 = vadd.f32 1.0, %v1999_v33 }
  0xe9   :  { %v2001_v34 = vpop.eup %2000  ;;  %v428_v36 = vmul.f32 1.442695, %v355_v31  ;;  %785 = vperm.xlu0 %1888, %v1997_v26   ;;  %v323_v37 = vadd.f32 %v281_v28, %v239_v21  ;;  %2018 = vpow2.f32 %v438_v24  ;;  %v236_v44 = vpop.xlane.xlu0 %235  ;;  %v955_v28 = vld [vmem:[%s3449_s4 + $0x8] sm:$0xff]  ;;  %v534_v31 = vld [vmem:[%s3450_s3] sm:$0xff]  ;;  %v536_v21 = vld [vmem:[%s3450_s3 + $0x10] sm:$0xff] }
  0xea   :  { %v2003_v38 = vpop.eup %2002  ;;  %v487_v39 = vadd.f32 1.0, %v2001_v34  ;;  %2020 = vpow2.f32 %v422_v29  ;;  %v322_v54 = vadd.f32 %v280_v43, %v236_v44  ;;  %v426_v62 = vmul.f32 1.442695, %v354_v53  ;;  %v958_v29 = vld [vmem:[%s3449_s4 + $0x20] sm:$0xff]  ;;  %v537_v34 = vld [vmem:[%s3450_s3 + $0x18] sm:$0xff]  ;;  %v539_v44 = vld [vmem:[%s3450_s3 + $0x28] sm:$0xff] }
  0xeb   :  { %2022 = vpow2.f32 %v428_v36  ;;  %v365_v42 = vsub.f32 0.0, %v323_v37  ;;  %v2005_v45 = vpop.eup %2004  ;;  %v1081_v30 = vpack.c.bf16 %v958_v29, %v955_v28  ;;  %v538_v43 = vld [vmem:[%s3450_s3 + $0x20] sm:$0xff] }
  0xec   :  { %2024 = vrcp.f32 %v487_v39  ;;  %710 = vperm.xlu1 %1889, %v1985_v11   ;;  %v364_v63 = vsub.f32 0.0, %v322_v54 }
  0xed   :  { %v2007_v46 = vpop.eup %2006  ;;  %2026 = vrcp.f32 %v474_v35  ;;  %v448_v47 = vmul.f32 1.442695, %v365_v42  ;;  %745 = vperm.xlu0 %1888, %v2003_v38   ;;  %1239 = vmatprep.mubr.bf16.mxu1 %v1081_v30 }
  0xee   :  { %v2009_v48 = vpop.eup %2008  ;;  %v479_v51 = vadd.f32 1.0, %v2007_v46  ;;  %v446_v12 = vmul.f32 1.442695, %v364_v63  ;;  %v541_v46 = vld [vmem:[%s3450_s3 + $0x38] sm:$0xff] }
  0xef   :  { %v2011_v55 = vpop.eup %2010  ;;  %2028 = vpow2.f32 %v448_v47 }
  0xf0   :  { %v2013_v58 = vpop.eup %2012  ;;  %2030 = vrcp.f32 %v479_v51  ;;  %720 = vperm.xlu1 %1889, %v1991_v14   ;;  %v476_v7 = vadd.f32 1.0, %v2011_v55 }
  0xf1   :  { %v2015_v59 = vpop.eup %2014  ;;  %795 = vperm.xlu0 %1888, %v2009_v48   ;;  %2032 = vpow2.f32 %v442_v52 }
  0xf2   :  { %v2017_v60 = vpop.eup %2016  ;;  %v489_v61 = vadd.f32 1.0, %v2015_v59  ;;  %2034 = vrcp.f32 %v484_v56  ;;  %v542_v59 = vld [vmem:[%s3450_s3 + $0x40] sm:$0xff] }
  0xf3   :  { %v2019_v6 = vpop.eup %2018 }
  0xf4   :  { %v2021_v8 = vpop.eup %2020  ;;  %2036 = vrcp.f32 %v489_v61  ;;  %730 = vperm.xlu1 %1889, %v2005_v45   ;;  %v486_v49 = vadd.f32 1.0, %v2019_v6  ;;  %v540_v45 = vld [vmem:[%s3450_s3 + $0x30] sm:$0xff] }
  0xf5   :  { %v2023_v10 = vpop.eup %2022  ;;  %755 = vperm.xlu0 %1888, %v2017_v60   ;;  %2038 = vpow2.f32 %v426_v62  ;;  %v478_v4 = vadd.f32 1.0, %v2021_v8  ;;  %v543_v60 = vld [vmem:[%s3450_s3 + $0x48] sm:$0xff]  ;;  %v544_v61 = vld [vmem:[%s3450_s3 + $0x50] sm:$0xff]  ;;  %v545_v62 = vld [vmem:[%s3450_s3 + $0x58] sm:$0xff] }
  0xf6   :  { %v2025_v11 = vpop.eup %2024  ;;  %v481_v15 = vadd.f32 1.0, %v2023_v10  ;;  %2040 = vrcp.f32 %v476_v7 }
  0xf7   :  { %v2027_v16 = vpop.eup %2026 }
  0xf8   :  { %2042 = vrcp.f32 %v481_v15  ;;  %780 = vperm.xlu1 %1889, %v2013_v58  }
  0xf9   :  { %v2029_v50 = vpop.eup %2028  ;;  %805 = vperm.xlu0 %1888, %v2025_v11   ;;  %2044 = vpow2.f32 %v446_v12 }
  0xfa   :  { %v2031_v0 = vpop.eup %2030  ;;  %v491_v3 = vadd.f32 1.0, %v2029_v50  ;;  %2046 = vrcp.f32 %v486_v49  ;;  %v546_v50 = vld [vmem:[%s3450_s3 + $0x60] sm:$0xff] }
  0xfb   :  { %v2033_v1 = vpop.eup %2032 }
  0xfc   :  { %2048 = vrcp.f32 %v491_v3  ;;  %740 = vperm.xlu1 %1889, %v2027_v16   ;;  %v2035_v2 = vpop.eup %2034  ;;  %v488_v13 = vadd.f32 1.0, %v2033_v1  ;;  %v548_v3 = vld [vmem:[%s3450_s3 + $0x70] sm:$0xff] }
  0xfd   :  { %765 = vperm.xlu0 %1888, %v2031_v0   ;;  %2050 = vrcp.f32 %v478_v4  ;;  %v547_v0 = vld [vmem:[%s3450_s3 + $0x68] sm:$0xff]  ;;  %v549_v4 = vld [vmem:[%s3450_s3 + $0x78] sm:$0xff] }
  0xfe   :  { %v2037_v5 = vpop.eup %2036  ;;  %2052 = vrcp.f32 %v488_v13 }
  0xff   :  { %v2039_v14 = vpop.eup %2038 }
 0x100   :  { %790 = vperm.xlu1 %1889, %v2035_v2   ;;  %v2041_v9 = vpop.eup %2040  ;;  %v480_v18 = vadd.f32 1.0, %v2039_v14  ;;  %v552_v2 = vld [vmem:[%s3450_s3 + $0x90] sm:$0xff] }
 0x101   :  { %815 = vperm.xlu0 %1888, %v2037_v5  }
 0x102   :  { %v2043_v17 = vpop.eup %2042  ;;  %2054 = vrcp.f32 %v480_v18  ;;  %v553_v18 = vld [vmem:[%s3450_s3 + $0x98] sm:$0xff] }
 0x103   :  { %v2045_v19 = vpop.eup %2044 }
 0x104   :  { %750 = vperm.xlu1 %1889, %v2041_v9   ;;  %v2047_v20 = vpop.eup %2046  ;;  %v490_v23 = vadd.f32 1.0, %v2045_v19  ;;  %v550_v19 = vld [vmem:[%s3450_s3 + $0x80] sm:$0xff] }
 0x105   :  { %775 = vperm.xlu0 %1888, %v2043_v17  }
 0x106   :  { %v2049_v22 = vpop.eup %2048  ;;  %2056 = vrcp.f32 %v490_v23 }
 0x107   :  { %v2051_v24 = vpop.eup %2050 }
 0x108   :  { %800 = vperm.xlu1 %1889, %v2047_v20   ;;  %v2053_v25 = vpop.eup %2052  ;;  %v551_v20 = vld [vmem:[%s3450_s3 + $0x88] sm:$0xff] }
 0x109   :  { %825 = vperm.xlu0 %1888, %v2049_v22  }
 0x10c   :  { %760 = vperm.xlu1 %1889, %v2051_v24   ;;  %v2055_v26 = vpop.eup %2054 }
 0x110   :  { %810 = vperm.xlu1 %1889, %v2053_v25   ;;  %v2057_v27 = vpop.eup %2056 }
 0x114   :  { %770 = vperm.xlu1 %1889, %v2055_v26  }
 0x118   :  { %820 = vperm.xlu1 %1889, %v2057_v27   ;;  %v556_v27 = vld [vmem:[%s3450_s3 + $0xb0] sm:$0xff] }
 0x137   :  { %v621_v33 = vpop.permute.xlu0 %620 }
 0x138   :  { %v828_v36 = vmul.f32 %v621_v33, %v534_v31  ;;  %v829_v37 = vmul.f32 %v621_v33, %v535_v32  ;;  %v557_v31 = vld [vmem:[%s3450_s3 + $0xb8] sm:$0xff]  ;;  %v554_v32 = vld [vmem:[%s3450_s3 + $0xa0] sm:$0xff]  ;;  %v555_v33 = vld [vmem:[%s3450_s3 + $0xa8] sm:$0xff] }
 0x13b   :  { %v626_v35 = vpop.permute.xlu1 %625 }
 0x13c   :  { %v830_v38 = vmul.f32 %v626_v35, %v536_v21  ;;  %v831_v39 = vmul.f32 %v626_v35, %v537_v34 }
 0x13e   :  { %v913_v40 = vpack.c.bf16 %v831_v39, %v829_v37  ;;  %v912_v41 = vpack.c.bf16 %v830_v38, %v828_v36  ;;  %v560_v38 = vld [vmem:[%s3450_s3 + $0xd0] sm:$0xff] }
 0x13f   :  { %v631_v42 = vpop.permute.xlu1 %630 }
 0x140   :  { %1207 = vmatprep.subr.bf16.mxu1 %v913_v40  ;;  %v832_v48 = vmul.f32 %v631_v42, %v538_v43  ;;  %v833_v51 = vmul.f32 %v631_v42, %v539_v44  ;;  %v561_v42 = vld [vmem:[%s3450_s3 + $0xd8] sm:$0xff]  ;;  %v558_v43 = vld [vmem:[%s3450_s3 + $0xc0] sm:$0xff]  ;;  %v559_v44 = vld [vmem:[%s3450_s3 + $0xc8] sm:$0xff] }
 0x141   :  { %1208 = vmatpush1.bf16.msra.mxu1 %v912_v41 }
 0x143   :  { %v636_v47 = vpop.permute.xlu1 %635 }
 0x144   :  { %v834_v52 = vmul.f32 %v636_v47, %v540_v45  ;;  %v835_v53 = vmul.f32 %v636_v47, %v541_v46 }
 0x146   :  { %v914_v54 = vpack.c.bf16 %v834_v52, %v832_v48  ;;  %v915_v55 = vpack.c.bf16 %v835_v53, %v833_v51  ;;  %v666_v56 = vpop.permute.xlu0 %665  ;;  %v564_v52 = vld [vmem:[%s3450_s3 + $0xf0] sm:$0xff] }
 0x147   :  { %v641_v58 = vpop.permute.xlu1 %640  ;;  %v846_v25 = vmul.f32 %v666_v56, %v552_v2  ;;  %v847_v26 = vmul.f32 %v666_v56, %v553_v18  ;;  %v565_v56 = vld [vmem:[%s3450_s3 + $0xf8] sm:$0xff] }
 0x148   :  { %1209 = vmatprep.subr.bf16.mxu1 %v915_v55  ;;  %v836_v7 = vmul.f32 %v641_v58, %v542_v59  ;;  %v837_v8 = vmul.f32 %v641_v58, %v543_v60  ;;  %v562_v58 = vld [vmem:[%s3450_s3 + $0xe0] sm:$0xff]  ;;  %v563_v59 = vld [vmem:[%s3450_s3 + $0xe8] sm:$0xff] }
 0x149   :  { %1210 = vmatpush1.bf16.msra.mxu1 %v914_v54 }
 0x14a   :  { %v676_v63 = vpop.permute.xlu0 %675 }
 0x14b   :  { %v646_v6 = vpop.permute.xlu1 %645  ;;  %v850_v36 = vmul.f32 %v676_v63, %v556_v27  ;;  %v851_v37 = vmul.f32 %v676_v63, %v557_v31 }
 0x14c   :  { %v838_v10 = vmul.f32 %v646_v6, %v544_v61  ;;  %v839_v11 = vmul.f32 %v646_v6, %v545_v62 }
 0x14e   :  { %v916_v15 = vpack.c.bf16 %v838_v10, %v836_v7  ;;  %v917_v12 = vpack.c.bf16 %v839_v11, %v837_v8  ;;  %v686_v16 = vpop.permute.xlu0 %685  ;;  %v568_v7 = vld [vmem:[%s3450_s3 + $0x110] sm:$0xff] }
 0x14f   :  { %v651_v49 = vpop.permute.xlu1 %650  ;;  %v854_v48 = vmul.f32 %v686_v16, %v560_v38  ;;  %v855_v51 = vmul.f32 %v686_v16, %v561_v42  ;;  %v567_v16 = vld [vmem:[%s3450_s3 + $0x108] sm:$0xff]  ;;  %v581_v38 = vld [vmem:[%s3450_s3 + $0x178] sm:$0xff] }
 0x150   :  { %1211 = vmatprep.subr.bf16.mxu1 %v917_v12  ;;  %v840_v5 = vmul.f32 %v651_v49, %v546_v50  ;;  %v841_v13 = vmul.f32 %v651_v49, %v547_v0  ;;  %v566_v12 = vld [vmem:[%s3450_s3 + $0x100] sm:$0xff] }
 0x151   :  { %1212 = vmatpush1.bf16.msra.mxu1 %v916_v15  ;;  %v569_v15 = vld [vmem:[%s3450_s3 + $0x118] sm:$0xff] }
 0x153   :  { %v656_v1 = vpop.permute.xlu1 %655 }
 0x154   :  { %v842_v14 = vmul.f32 %v656_v1, %v548_v3  ;;  %v843_v9 = vmul.f32 %v656_v1, %v549_v4  ;;  %v696_v17 = vpop.permute.xlu0 %695  ;;  %v572_v1 = vld [vmem:[%s3450_s3 + $0x130] sm:$0xff] }
 0x155   :  { %v858_v63 = vmul.f32 %v696_v17, %v564_v52  ;;  %v859_v6 = vmul.f32 %v696_v17, %v565_v56  ;;  %v571_v17 = vld [vmem:[%s3450_s3 + $0x128] sm:$0xff]  ;;  %v601_v52 = vld [vmem:[%s3450_s3 + $0x218] sm:$0xff] }
 0x156   :  { %v918_v22 = vpack.c.bf16 %v842_v14, %v840_v5  ;;  %v919_v23 = vpack.c.bf16 %v843_v9, %v841_v13  ;;  %v573_v14 = vld [vmem:[%s3450_s3 + $0x138] sm:$0xff]  ;;  %v570_v9 = vld [vmem:[%s3450_s3 + $0x120] sm:$0xff] }
 0x157   :  { %v661_v24 = vpop.permute.xlu1 %660 }
 0x158   :  { %v844_v28 = vmul.f32 %v661_v24, %v550_v19  ;;  %v845_v29 = vmul.f32 %v661_v24, %v551_v20  ;;  %v706_v30 = vpop.permute.xlu0 %705  ;;  %1213 = vmatprep.subr.bf16.mxu1 %v919_v23  ;;  %v576_v24 = vld [vmem:[%s3450_s3 + $0x150] sm:$0xff] }
 0x159   :  { %1214 = vmatpush1.bf16.msra.mxu1 %v918_v22  ;;  %v862_v3 = vmul.f32 %v706_v30, %v568_v7  ;;  %v863_v4 = vmul.f32 %v706_v30, %v569_v15  ;;  %v575_v30 = vld [vmem:[%s3450_s3 + $0x148] sm:$0xff]  ;;  %v585_v7 = vld [vmem:[%s3450_s3 + $0x198] sm:$0xff] }
 0x15a   :  { %v920_v21 = vpack.c.bf16 %v846_v25, %v844_v28  ;;  %v921_v34 = vpack.c.bf16 %v847_v26, %v845_v29  ;;  %v577_v28 = vld [vmem:[%s3450_s3 + $0x158] sm:$0xff]  ;;  %v574_v29 = vld [vmem:[%s3450_s3 + $0x140] sm:$0xff] }
 0x15b   :  { %v671_v35 = vpop.permute.xlu1 %670 }
 0x15c   :  { %v848_v39 = vmul.f32 %v671_v35, %v554_v32  ;;  %v849_v40 = vmul.f32 %v671_v35, %v555_v33  ;;  %v716_v41 = vpop.permute.xlu0 %715  ;;  %1215 = vmatprep.subr.bf16.mxu1 %v921_v34  ;;  %v580_v35 = vld [vmem:[%s3450_s3 + $0x170] sm:$0xff] }
 0x15d   :  { %1216 = vmatpush1.bf16.msra.mxu1 %v920_v21  ;;  %v866_v22 = vmul.f32 %v716_v41, %v572_v1  ;;  %v867_v23 = vmul.f32 %v716_v41, %v573_v14  ;;  %v579_v41 = vld [vmem:[%s3450_s3 + $0x168] sm:$0xff] }
 0x15e   :  { %v922_v45 = vpack.c.bf16 %v850_v36, %v848_v39  ;;  %v923_v46 = vpack.c.bf16 %v851_v37, %v849_v40  ;;  %v578_v40 = vld [vmem:[%s3450_s3 + $0x160] sm:$0xff] }
 0x15f   :  { %v681_v47 = vpop.permute.xlu1 %680 }
 0x160   :  { %v852_v53 = vmul.f32 %v681_v47, %v558_v43  ;;  %v853_v54 = vmul.f32 %v681_v47, %v559_v44  ;;  %v726_v55 = vpop.permute.xlu0 %725  ;;  %1217 = vmatprep.subr.bf16.mxu1 %v923_v46  ;;  %v600_v47 = vld [vmem:[%s3450_s3 + $0x210] sm:$0xff] }
 0x161   :  { %1218 = vmatpush1.bf16.msra.mxu1 %v922_v45  ;;  %v870_v21 = vmul.f32 %v726_v55, %v576_v24  ;;  %v871_v34 = vmul.f32 %v726_v55, %v577_v28  ;;  %v586_v24 = vld [vmem:[%s3450_s3 + $0x1a0] sm:$0xff] }
 0x162   :  { %v924_v60 = vpack.c.bf16 %v854_v48, %v852_v53  ;;  %v925_v61 = vpack.c.bf16 %v855_v51, %v853_v54  ;;  %v598_v53 = vld [vmem:[%s3450_s3 + $0x200] sm:$0xff]  ;;  %v599_v54 = vld [vmem:[%s3450_s3 + $0x208] sm:$0xff] }
 0x163   :  { %v691_v62 = vpop.permute.xlu1 %690 }
 0x164   :  { %v856_v8 = vmul.f32 %v691_v62, %v562_v58  ;;  %v857_v10 = vmul.f32 %v691_v62, %v563_v59  ;;  %v736_v11 = vpop.permute.xlu0 %735  ;;  %1219 = vmatprep.subr.bf16.mxu1 %v925_v61  ;;  %v584_v62 = vld [vmem:[%s3450_s3 + $0x190] sm:$0xff] }
 0x165   :  { %1220 = vmatpush1.bf16.msra.mxu1 %v924_v60  ;;  %v874_v45 = vmul.f32 %v736_v11, %v580_v35  ;;  %v875_v46 = vmul.f32 %v736_v11, %v581_v38  ;;  %v606_v35 = vld [vmem:[%s3450_s3 + $0x240] sm:$0xff] }
 0x166   :  { %v926_v49 = vpack.c.bf16 %v858_v63, %v856_v8  ;;  %v927_v50 = vpack.c.bf16 %v859_v6, %v857_v10  ;;  %v582_v8 = vld [vmem:[%s3450_s3 + $0x180] sm:$0xff]  ;;  %v583_v10 = vld [vmem:[%s3450_s3 + $0x188] sm:$0xff] }
 0x167   :  { %v701_v0 = vpop.permute.xlu1 %700 }
 0x168   :  { %v860_v2 = vmul.f32 %v701_v0, %v566_v12  ;;  %v861_v5 = vmul.f32 %v701_v0, %v567_v16  ;;  %v786_v13 = vpop.permute.xlu0 %785  ;;  %1221 = vmatprep.subr.bf16.mxu1 %v927_v50  ;;  %v604_v50 = vld [vmem:[%s3450_s3 + $0x230] sm:$0xff] }
 0x169   :  { %1222 = vmatpush1.bf16.msra.mxu1 %v926_v49  ;;  %v894_v60 = vmul.f32 %v786_v13, %v600_v47  ;;  %v895_v61 = vmul.f32 %v786_v13, %v601_v52  ;;  %v590_v47 = vld [vmem:[%s3450_s3 + $0x1c0] sm:$0xff] }
 0x16a   :  { %v928_v18 = vpack.c.bf16 %v862_v3, %v860_v2  ;;  %v929_v19 = vpack.c.bf16 %v863_v4, %v861_v5  ;;  %v605_v4 = vld [vmem:[%s3450_s3 + $0x238] sm:$0xff]  ;;  %v602_v2 = vld [vmem:[%s3450_s3 + $0x220] sm:$0xff]  ;;  %v603_v5 = vld [vmem:[%s3450_s3 + $0x228] sm:$0xff] }
 0x16b   :  { %v711_v20 = vpop.permute.xlu1 %710 }
 0x16c   :  { %v864_v25 = vmul.f32 %v711_v20, %v570_v9  ;;  %v865_v26 = vmul.f32 %v711_v20, %v571_v17  ;;  %v746_v27 = vpop.permute.xlu0 %745  ;;  %1223 = vmatprep.subr.bf16.mxu1 %v929_v19  ;;  %v588_v19 = vld [vmem:[%s3450_s3 + $0x1b0] sm:$0xff] }
 0x16d   :  { %1224 = vmatpush1.bf16.msra.mxu1 %v928_v18  ;;  %v878_v16 = vmul.f32 %v746_v27, %v584_v62  ;;  %v879_v49 = vmul.f32 %v746_v27, %v585_v7  ;;  %v611_v62 = vld [vmem:[%s3450_s3 + $0x268] sm:$0xff] }
 0x16e   :  { %v930_v31 = vpack.c.bf16 %v866_v22, %v864_v25  ;;  %v931_v32 = vpack.c.bf16 %v867_v23, %v865_v26  ;;  %v589_v23 = vld [vmem:[%s3450_s3 + $0x1b8] sm:$0xff]  ;;  %v587_v25 = vld [vmem:[%s3450_s3 + $0x1a8] sm:$0xff] }
 0x16f   :  { %v721_v33 = vpop.permute.xlu1 %720 }
 0x170   :  { %v868_v36 = vmul.f32 %v721_v33, %v574_v29  ;;  %v869_v37 = vmul.f32 %v721_v33, %v575_v30  ;;  %1225 = vmatprep.subr.bf16.mxu1 %v931_v32  ;;  %v796_v39 = vpop.permute.xlu0 %795  ;;  %v608_v32 = vld [vmem:[%s3450_s3 + $0x250] sm:$0xff] }
 0x171   :  { %1226 = vmatpush1.bf16.msra.mxu1 %v930_v31  ;;  %v898_v17 = vmul.f32 %v796_v39, %v604_v50  ;;  %v899_v18 = vmul.f32 %v796_v39, %v605_v4  ;;  %v594_v50 = vld [vmem:[%s3450_s3 + $0x1e0] sm:$0xff] }
 0x172   :  { %v932_v42 = vpack.c.bf16 %v870_v21, %v868_v36  ;;  %v933_v43 = vpack.c.bf16 %v871_v34, %v869_v37  ;;  %v609_v34 = vld [vmem:[%s3450_s3 + $0x258] sm:$0xff]  ;;  %v607_v36 = vld [vmem:[%s3450_s3 + $0x248] sm:$0xff] }
 0x173   :  { %v731_v44 = vpop.permute.xlu1 %730 }
 0x174   :  { %v872_v48 = vmul.f32 %v731_v44, %v578_v40  ;;  %v873_v51 = vmul.f32 %v731_v44, %v579_v41  ;;  %1227 = vmatprep.subr.bf16.mxu1 %v933_v43  ;;  %v756_v58 = vpop.permute.xlu0 %755 }
 0x175   :  { %1228 = vmatpush1.bf16.msra.mxu1 %v932_v42  ;;  %v882_v30 = vmul.f32 %v756_v58, %v588_v19  ;;  %v883_v31 = vmul.f32 %v756_v58, %v589_v23  ;;  %v592_v42 = vld [vmem:[%s3450_s3 + $0x1d0] sm:$0xff]  ;;  %v617_v19 = vld [vmem:[%s3450_s3 + $0x298] sm:$0xff]  ;;  %v615_v23 = vld [vmem:[%s3450_s3 + $0x288] sm:$0xff] }
 0x176   :  { %v934_v55 = vpack.c.bf16 %v874_v45, %v872_v48  ;;  %v935_v56 = vpack.c.bf16 %v875_v46, %v873_v51  ;;  %v593_v45 = vld [vmem:[%s3450_s3 + $0x1d8] sm:$0xff]  ;;  %v591_v48 = vld [vmem:[%s3450_s3 + $0x1c8] sm:$0xff] }
 0x177   :  { %v781_v59 = vpop.permute.xlu1 %780 }
 0x178   :  { %v892_v63 = vmul.f32 %v781_v59, %v598_v53  ;;  %v893_v6 = vmul.f32 %v781_v59, %v599_v54  ;;  %1229 = vmatprep.subr.bf16.mxu1 %v935_v56  ;;  %v806_v1 = vpop.permute.xlu0 %805  ;;  %v612_v56 = vld [vmem:[%s3450_s3 + $0x270] sm:$0xff] }
 0x179   :  { %1230 = vmatpush1.bf16.msra.mxu1 %v934_v55  ;;  %v902_v40 = vmul.f32 %v806_v1, %v608_v32  ;;  %v903_v41 = vmul.f32 %v806_v1, %v609_v34  ;;  %v959_v34 = vld [vmem:[%s3449_s4 + $0x28] sm:$0xff] }
 0x17a   :  { %v945_v11 = vpack.c.bf16 %v895_v61, %v893_v6  ;;  %v944_v15 = vpack.c.bf16 %v894_v60, %v892_v63  ;;  %v613_v60 = vld [vmem:[%s3450_s3 + $0x278] sm:$0xff]  ;;  %v610_v61 = vld [vmem:[%s3450_s3 + $0x260] sm:$0xff] }
 0x17b   :  { %v741_v12 = vpop.permute.xlu1 %740 }
 0x17c   :  { %v876_v0 = vmul.f32 %v741_v12, %v582_v8  ;;  %v877_v3 = vmul.f32 %v741_v12, %v583_v10  ;;  %1450 = vmatprep.subr.bf16.mxu0 %v945_v11  ;;  %v766_v28 = vpop.permute.xlu0 %765 }
 0x17d   :  { %1451 = vmatpush1.bf16.msra.mxu0 %v944_v15  ;;  %v886_v54 = vmul.f32 %v766_v28, %v592_v42  ;;  %v887_v55 = vmul.f32 %v766_v28, %v593_v45  ;;  %v596_v15 = vld [vmem:[%s3450_s3 + $0x1f0] sm:$0xff]  ;;  %v970_v42 = vld [vmem:[%s3449_s4 + $0x80] sm:$0xff]  ;;  %v965_v45 = vld [vmem:[%s3449_s4 + $0x58] sm:$0xff] }
 0x17e   :  { %v936_v13 = vpack.c.bf16 %v878_v16, %v876_v0  ;;  %v937_v14 = vpack.c.bf16 %v879_v49, %v877_v3  ;;  %v597_v49 = vld [vmem:[%s3450_s3 + $0x1f8] sm:$0xff]  ;;  %v595_v0 = vld [vmem:[%s3450_s3 + $0x1e8] sm:$0xff] }
 0x17f   :  { %v791_v9 = vpop.permute.xlu1 %790 }
 0x180   :  { %v896_v20 = vmul.f32 %v791_v9, %v602_v2  ;;  %v897_v22 = vmul.f32 %v791_v9, %v603_v5  ;;  %1231 = vmatprep.subr.bf16.mxu1 %v937_v14  ;;  %v816_v46 = vpop.permute.xlu0 %815 }
 0x181   :  { %1232 = vmatpush1.bf16.msra.mxu1 %v936_v13  ;;  %v906_v10 = vmul.f32 %v816_v46, %v612_v56  ;;  %v907_v11 = vmul.f32 %v816_v46, %v613_v60  ;;  %v616_v13 = vld [vmem:[%s3450_s3 + $0x290] sm:$0xff]  ;;  %v971_v56 = vld [vmem:[%s3449_s4 + $0x88] sm:$0xff] }
 0x182   :  { %v946_v26 = vpack.c.bf16 %v898_v17, %v896_v20  ;;  %v947_v27 = vpack.c.bf16 %v899_v18, %v897_v22  ;;  %v954_v17 = vld [vmem:[%s3449_s4] sm:$0xff]  ;;  %v957_v18 = vld [vmem:[%s3449_s4 + $0x18] sm:$0xff]  ;;  %v972_v60 = vld [vmem:[%s3449_s4 + $0x90] sm:$0xff] }
 0x183   :  { %v751_v29 = vpop.permute.xlu1 %750  ;;  %v614_v22 = vld [vmem:[%s3450_s3 + $0x280] sm:$0xff] }
 0x184   :  { %v880_v33 = vmul.f32 %v751_v29, %v586_v24  ;;  %v881_v21 = vmul.f32 %v751_v29, %v587_v25  ;;  %1452 = vmatprep.subr.bf16.mxu0 %v947_v27  ;;  %v776_v7 = vpop.permute.xlu0 %775  ;;  %v964_v27 = vld [vmem:[%s3449_s4 + $0x50] sm:$0xff]  ;;  %v1080_v29 = vpack.c.bf16 %v957_v18, %v954_v17  ;;  %v986_v17 = vld [vmem:[%s3449_s4 + $0x100] sm:$0xff]  ;;  %v989_v18 = vld [vmem:[%s3449_s4 + $0x118] sm:$0xff] }
 0x185   :  { %1453 = vmatpush1.bf16.msra.mxu0 %v946_v26  ;;  %v890_v2 = vmul.f32 %v776_v7, %v596_v15  ;;  %v891_v5 = vmul.f32 %v776_v7, %v597_v49  ;;  %v961_v26 = vld [vmem:[%s3449_s4 + $0x38] sm:$0xff]  ;;  %v974_v7 = vld [vmem:[%s3449_s4 + $0xa0] sm:$0xff]  ;;  %v988_v49 = vld [vmem:[%s3449_s4 + $0x110] sm:$0xff] }
 0x186   :  { %v938_v37 = vpack.c.bf16 %v882_v30, %v880_v33  ;;  %v939_v38 = vpack.c.bf16 %v883_v31, %v881_v21  ;;  %v956_v21 = vld [vmem:[%s3449_s4 + $0x10] sm:$0xff]  ;;  %v978_v15 = vld [vmem:[%s3449_s4 + $0xc0] sm:$0xff] }
 0x187   :  { %v801_v39 = vpop.permute.xlu1 %800 }
 0x188   :  { %v900_v43 = vmul.f32 %v801_v39, %v606_v35  ;;  %v901_v44 = vmul.f32 %v801_v39, %v607_v36  ;;  %1233 = vmatprep.subr.bf16.mxu1 %v939_v38  ;;  %v826_v20 = vpop.permute.xlu0 %825  ;;  %v1084_v35 = vpack.c.bf16 %v964_v27, %v961_v26  ;;  %v1082_v38 = vpack.c.bf16 %v959_v34, %v956_v21  ;;  %v960_v39 = vld [vmem:[%s3449_s4 + $0x30] sm:$0xff]  ;;  %v1006_v21 = vld [vmem:[%s3449_s4 + $0x1a0] sm:$0xff] }
 0x189   :  { %1234 = vmatpush1.bf16.msra.mxu1 %v938_v37  ;;  %v910_v30 = vmul.f32 %v826_v20, %v616_v13  ;;  %v911_v31 = vmul.f32 %v826_v20, %v617_v19  ;;  %v991_v13 = vld [vmem:[%s3449_s4 + $0x128] sm:$0xff]  ;;  %v1097_v20 = vpack.c.bf16 %v989_v18, %v986_v17  ;;  %v992_v27 = vld [vmem:[%s3449_s4 + $0x130] sm:$0xff] }
 0x18a   :  { %v948_v51 = vpack.c.bf16 %v902_v40, %v900_v43  ;;  %v949_v52 = vpack.c.bf16 %v903_v41, %v901_v44  ;;  %v963_v40 = vld [vmem:[%s3449_s4 + $0x48] sm:$0xff]  ;;  %v962_v44 = vld [vmem:[%s3449_s4 + $0x40] sm:$0xff]  ;;  %v1028_v17 = vld [vmem:[%s3449_s4 + $0x250] sm:$0xff] }
 0x18b   :  { %v761_v53 = vpop.permute.xlu1 %760  ;;  %v967_v41 = vld [vmem:[%s3449_s4 + $0x68] sm:$0xff]  ;;  %v1083_v43 = vpack.c.bf16 %v963_v40, %v960_v39  ;;  %v1002_v39 = vld [vmem:[%s3449_s4 + $0x180] sm:$0xff]  ;;  %v1005_v40 = vld [vmem:[%s3449_s4 + $0x198] sm:$0xff] }
 0x18c   :  { %v884_v58 = vmul.f32 %v761_v53, %v590_v47  ;;  %v885_v59 = vmul.f32 %v761_v53, %v591_v48  ;;  %1454 = vmatprep.subr.bf16.mxu0 %v949_v52  ;;  %v1087_v46 = vpack.c.bf16 %v970_v42, %v967_v41  ;;  %v1085_v47 = vpack.c.bf16 %v965_v45, %v962_v44  ;;  %v966_v48 = vld [vmem:[%s3449_s4 + $0x60] sm:$0xff]  ;;  %v973_v52 = vld [vmem:[%s3449_s4 + $0x98] sm:$0xff]  ;;  %v976_v53 = vld [vmem:[%s3449_s4 + $0xb0] sm:$0xff] }
 0x18d   :  { %1455 = vmatpush1.bf16.msra.mxu0 %v948_v51  ;;  %v969_v51 = vld [vmem:[%s3449_s4 + $0x78] sm:$0xff]  ;;  %v1012_v42 = vld [vmem:[%s3449_s4 + $0x1d0] sm:$0xff]  ;;  %v1007_v45 = vld [vmem:[%s3449_s4 + $0x1a8] sm:$0xff] }
 0x18e   :  { %v940_v63 = vpack.c.bf16 %v886_v54, %v884_v58  ;;  %v941_v6 = vpack.c.bf16 %v887_v55, %v885_v59  ;;  %v1086_v54 = vpack.c.bf16 %v969_v51, %v966_v48  ;;  %v968_v55 = vld [vmem:[%s3449_s4 + $0x70] sm:$0xff]  ;;  %v1090_v58 = vpack.c.bf16 %v976_v53, %v973_v52  ;;  %v1009_v41 = vld [vmem:[%s3449_s4 + $0x1b8] sm:$0xff]  ;;  %v1011_v51 = vld [vmem:[%s3449_s4 + $0x1c8] sm:$0xff] }
 0x18f   :  { %v811_v8 = vpop.permute.xlu1 %810  ;;  %v1088_v59 = vpack.c.bf16 %v971_v56, %v968_v55  ;;  %v1004_v44 = vld [vmem:[%s3449_s4 + $0x190] sm:$0xff]  ;;  %v1015_v52 = vld [vmem:[%s3449_s4 + $0x1e8] sm:$0xff]  ;;  %v1018_v53 = vld [vmem:[%s3449_s4 + $0x200] sm:$0xff] }
 0x190   :  { %v904_v12 = vmul.f32 %v811_v8, %v610_v61  ;;  %v905_v16 = vmul.f32 %v811_v8, %v611_v62  ;;  %1235 = vmatprep.subr.bf16.mxu1 %v941_v6  ;;  %v975_v61 = vld [vmem:[%s3449_s4 + $0xa8] sm:$0xff]  ;;  %v977_v8 = vld [vmem:[%s3449_s4 + $0xb8] sm:$0xff]  ;;  %v1008_v48 = vld [vmem:[%s3449_s4 + $0x1b0] sm:$0xff] }
 0x191   :  { %1236 = vmatpush1.bf16.msra.mxu1 %v940_v63  ;;  %v979_v62 = vld [vmem:[%s3449_s4 + $0xc8] sm:$0xff]  ;;  %v982_v63 = vld [vmem:[%s3449_s4 + $0xe0] sm:$0xff]  ;;  %v1089_v6 = vpack.c.bf16 %v975_v61, %v972_v60  ;;  %v1013_v56 = vld [vmem:[%s3449_s4 + $0x1d8] sm:$0xff] }
 0x192   :  { %v950_v3 = vpack.c.bf16 %v906_v10, %v904_v12  ;;  %v951_v4 = vpack.c.bf16 %v907_v11, %v905_v16  ;;  %v1093_v10 = vpack.c.bf16 %v982_v63, %v979_v62  ;;  %v1091_v11 = vpack.c.bf16 %v977_v8, %v974_v7  ;;  %v981_v12 = vld [vmem:[%s3449_s4 + $0xd8] sm:$0xff]  ;;  %v1010_v55 = vld [vmem:[%s3449_s4 + $0x1c0] sm:$0xff]  ;;  %v1024_v63 = vld [vmem:[%s3449_s4 + $0x230] sm:$0xff] }
 0x193   :  { %v771_v1 = vpop.permute.xlu1 %770  ;;  %v985_v16 = vld [vmem:[%s3449_s4 + $0xf8] sm:$0xff]  ;;  %v1014_v60 = vld [vmem:[%s3449_s4 + $0x1e0] sm:$0xff]  ;;  %v1016_v7 = vld [vmem:[%s3449_s4 + $0x1f0] sm:$0xff] }
 0x194   :  { %v888_v14 = vmul.f32 %v771_v1, %v594_v50  ;;  %v889_v9 = vmul.f32 %v771_v1, %v595_v0  ;;  %1456 = vmatprep.subr.bf16.mxu0 %v951_v4  ;;  %v1092_v50 = vpack.c.bf16 %v981_v12, %v978_v15  ;;  %v980_v0 = vld [vmem:[%s3449_s4 + $0xd0] sm:$0xff]  ;;  %v1096_v4 = vpack.c.bf16 %v988_v49, %v985_v16  ;;  %v1017_v61 = vld [vmem:[%s3449_s4 + $0x1f8] sm:$0xff]  ;;  %v1019_v8 = vld [vmem:[%s3449_s4 + $0x208] sm:$0xff] }
 0x195   :  { %1457 = vmatpush1.bf16.msra.mxu0 %v950_v3  ;;  %v983_v3 = vld [vmem:[%s3449_s4 + $0xe8] sm:$0xff]  ;;  %v1021_v62 = vld [vmem:[%s3449_s4 + $0x218] sm:$0xff]  ;;  %v1020_v15 = vld [vmem:[%s3449_s4 + $0x210] sm:$0xff] }
 0x196   :  { %v942_v24 = vpack.c.bf16 %v890_v2, %v888_v14  ;;  %v943_v25 = vpack.c.bf16 %v891_v5, %v889_v9  ;;  %v1094_v1 = vpack.c.bf16 %v983_v3, %v980_v0  ;;  %v984_v2 = vld [vmem:[%s3449_s4 + $0xf0] sm:$0xff]  ;;  %v987_v5 = vld [vmem:[%s3449_s4 + $0x108] sm:$0xff]  ;;  %v994_v14 = vld [vmem:[%s3449_s4 + $0x140] sm:$0xff] }
 0x197   :  { %v821_v28 = vpop.permute.xlu1 %820  ;;  %v1095_v9 = vpack.c.bf16 %v987_v5, %v984_v2  ;;  %v1099_v19 = vpack.c.bf16 %v994_v14, %v991_v13  ;;  %v1023_v12 = vld [vmem:[%s3449_s4 + $0x228] sm:$0xff]  ;;  %v1030_v49 = vld [vmem:[%s3449_s4 + $0x260] sm:$0xff]  ;;  %v1025_v3 = vld [vmem:[%s3449_s4 + $0x238] sm:$0xff] }
 0x198   :  { %v908_v32 = vmul.f32 %v821_v28, %v614_v22  ;;  %v909_v33 = vmul.f32 %v821_v28, %v615_v23  ;;  %1237 = vmatprep.subr.bf16.mxu1 %v943_v25  ;;  %v990_v22 = vld [vmem:[%s3449_s4 + $0x120] sm:$0xff]  ;;  %v993_v23 = vld [vmem:[%s3449_s4 + $0x138] sm:$0xff]  ;;  %v1000_v25 = vld [vmem:[%s3449_s4 + $0x170] sm:$0xff] }
 0x199   :  { %1238 = vmatpush1.bf16.msra.mxu1 %v942_v24  ;;  %v997_v24 = vld [vmem:[%s3449_s4 + $0x158] sm:$0xff]  ;;  %v1098_v26 = vpack.c.bf16 %v993_v23, %v990_v22  ;;  %v995_v28 = vld [vmem:[%s3449_s4 + $0x148] sm:$0xff]  ;;  %v1022_v0 = vld [vmem:[%s3449_s4 + $0x220] sm:$0xff] }
 0x19a   :  { %v952_v36 = vpack.c.bf16 %v910_v30, %v908_v32  ;;  %v953_v37 = vpack.c.bf16 %v911_v31, %v909_v33  ;;  %v1100_v30 = vpack.c.bf16 %v995_v28, %v992_v27  ;;  %v996_v31 = vld [vmem:[%s3449_s4 + $0x150] sm:$0xff]  ;;  %v999_v32 = vld [vmem:[%s3449_s4 + $0x168] sm:$0xff]  ;;  %v1026_v2 = vld [vmem:[%s3449_s4 + $0x240] sm:$0xff] }
 0x19b   :  { %v1003_v33 = vld [vmem:[%s3449_s4 + $0x188] sm:$0xff]  ;;  %v1101_v34 = vpack.c.bf16 %v999_v32, %v996_v31  ;;  %v1029_v5 = vld [vmem:[%s3449_s4 + $0x258] sm:$0xff]  ;;  %v1036_v14 = vld [vmem:[%s3449_s4 + $0x290] sm:$0xff] }
 0x19c   :  { %1458 = vmatprep.subr.bf16.mxu0 %v953_v37  ;;  %1240 = vmatmul.mubr.bf16.vlgmr.msra.gmra.mrb[0].mxu1 %v1080_v29  ;;  %v1102_v29 = vpack.c.bf16 %v1000_v25, %v997_v24  ;;  %v1105_v37 = vpack.c.bf16 %v1006_v21, %v1003_v33  ;;  %v1027_v16 = vld [vmem:[%s3449_s4 + $0x248] sm:$0xff]  ;;  %v1033_v13 = vld [vmem:[%s3449_s4 + $0x278] sm:$0xff]  ;;  %v1032_v22 = vld [vmem:[%s3449_s4 + $0x270] sm:$0xff] }
 0x19d   :  { %1459 = vmatpush1.bf16.msra.mxu0 %v952_v36  ;;  %1249 = vmatprep.mubr.bf16.mxu1 %v1084_v35  ;;  %v998_v35 = vld [vmem:[%s3449_s4 + $0x160] sm:$0xff]  ;;  %v1001_v36 = vld [vmem:[%s3449_s4 + $0x178] sm:$0xff]  ;;  %v1031_v18 = vld [vmem:[%s3449_s4 + $0x268] sm:$0xff] }
 0x19e   :  { %v1035_v23 = vld [vmem:[%s3449_s4 + $0x288] sm:$0xff]  ;;  %v1042_v25 = vld [vmem:[%s3449_s4 + $0x2c0] sm:$0xff]  ;;  %v1037_v28 = vld [vmem:[%s3449_s4 + $0x298] sm:$0xff] }
 0x19f   :  { %v1039_v24 = vld [vmem:[%s3449_s4 + $0x2a8] sm:$0xff]  ;;  %v1034_v27 = vld [vmem:[%s3449_s4 + $0x280] sm:$0xff]  ;;  %v1041_v32 = vld [vmem:[%s3449_s4 + $0x2b8] sm:$0xff] }
 0x1a0   :  { %1782 = vmatmul.mubr.msk.bf16.vlgmr.msra.gmra.mrb[0].mxu0 %vm1143_vm1, %v1082_v38  ;;  %v1103_v38 = vpack.c.bf16 %v1001_v36, %v998_v35  ;;  %v1038_v31 = vld [vmem:[%s3449_s4 + $0x2a0] sm:$0xff]  ;;  %v1045_v33 = vld [vmem:[%s3449_s4 + $0x2d8] sm:$0xff]  ;;  %v1048_v21 = vld [vmem:[%s3449_s4 + $0x2f0] sm:$0xff] }
 0x1a1   :  { %1492 = vmatprep.mubr.bf16.mxu0 %v2058_v57  ;;  %v1040_v35 = vld [vmem:[%s3449_s4 + $0x2b0] sm:$0xff]  ;;  %v1043_v36 = vld [vmem:[%s3449_s4 + $0x2c8] sm:$0xff] }
 0x1a4   :  { %1250 = vmatmul.mubr.bf16.gmra.mrb[4].mxu1 %v1083_v43  ;;  %v1104_v43 = vpack.c.bf16 %v1005_v40, %v1002_v39  ;;  %v1044_v39 = vld [vmem:[%s3449_s4 + $0x2d0] sm:$0xff]  ;;  %v1047_v40 = vld [vmem:[%s3449_s4 + $0x2e8] sm:$0xff] }
 0x1a5   :  { %1259 = vmatprep.mubr.bf16.mxu1 %v1087_v46  ;;  %v1108_v46 = vpack.c.bf16 %v1012_v42, %v1009_v41  ;;  %v1051_v41 = vld [vmem:[%s3449_s4 + $0x308] sm:$0xff]  ;;  %v1054_v42 = vld [vmem:[%s3449_s4 + $0x320] sm:$0xff] }
 0x1a8   :  { %1783 = vmatmul.mubr.msk.bf16.gmra.mrb[4].mxu0 %vm1143_vm1, %v1085_v47  ;;  %v1106_v47 = vpack.c.bf16 %v1007_v45, %v1004_v44  ;;  %v1046_v44 = vld [vmem:[%s3449_s4 + $0x2e0] sm:$0xff]  ;;  %v1049_v45 = vld [vmem:[%s3449_s4 + $0x2f8] sm:$0xff] }
 0x1a9   :  { %1502 = vmatprep.mubr.bf16.mxu0 %v2058_v57 }
 0x1ac   :  { %1260 = vmatmul.mubr.bf16.gmra.mrb[8].mxu1 %v1086_v54  ;;  %v1107_v54 = vpack.c.bf16 %v1011_v51, %v1008_v48  ;;  %v1050_v48 = vld [vmem:[%s3449_s4 + $0x300] sm:$0xff]  ;;  %v1053_v51 = vld [vmem:[%s3449_s4 + $0x318] sm:$0xff] }
 0x1ad   :  { %1269 = vmatprep.mubr.bf16.mxu1 %v1090_v58  ;;  %v1111_v58 = vpack.c.bf16 %v1018_v53, %v1015_v52  ;;  %v1057_v52 = vld [vmem:[%s3449_s4 + $0x338] sm:$0xff]  ;;  %v1060_v53 = vld [vmem:[%s3449_s4 + $0x350] sm:$0xff] }
 0x1b0   :  { %1784 = vmatmul.mubr.msk.bf16.gmra.mrb[8].mxu0 %vm1143_vm1, %v1088_v59  ;;  %v1109_v59 = vpack.c.bf16 %v1013_v56, %v1010_v55  ;;  %v1052_v55 = vld [vmem:[%s3449_s4 + $0x310] sm:$0xff]  ;;  %v1055_v56 = vld [vmem:[%s3449_s4 + $0x328] sm:$0xff] }
 0x1b1   :  { %1512 = vmatprep.mubr.bf16.mxu0 %v2058_v57 }
 0x1b4   :  { %1270 = vmatmul.mubr.bf16.gmra.mrb[12].mxu1 %v1089_v6  ;;  %v1110_v6 = vpack.c.bf16 %v1017_v61, %v1014_v60  ;;  %v1056_v60 = vld [vmem:[%s3449_s4 + $0x330] sm:$0xff]  ;;  %v1059_v61 = vld [vmem:[%s3449_s4 + $0x348] sm:$0xff] }
 0x1b5   :  { %1279 = vmatprep.mubr.bf16.mxu1 %v1093_v10  ;;  %v1114_v10 = vpack.c.bf16 %v1024_v63, %v1021_v62  ;;  %v1063_v62 = vld [vmem:[%s3449_s4 + $0x368] sm:$0xff]  ;;  %v1066_v63 = vld [vmem:[%s3449_s4 + $0x380] sm:$0xff] }
 0x1b8   :  { %1785 = vmatmul.mubr.msk.bf16.gmra.mrb[12].mxu0 %vm1143_vm1, %v1091_v11  ;;  %v1112_v11 = vpack.c.bf16 %v1019_v8, %v1016_v7  ;;  %v1058_v7 = vld [vmem:[%s3449_s4 + $0x340] sm:$0xff]  ;;  %v1061_v8 = vld [vmem:[%s3449_s4 + $0x358] sm:$0xff] }
 0x1b9   :  { %1522 = vmatprep.mubr.bf16.mxu0 %v2058_v57 }
 0x1bc   :  { %1280 = vmatmul.mubr.bf16.gmra.mrb[16].mxu1 %v1092_v50  ;;  %v1113_v50 = vpack.c.bf16 %v1023_v12, %v1020_v15  ;;  %v1062_v15 = vld [vmem:[%s3449_s4 + $0x360] sm:$0xff]  ;;  %v1065_v12 = vld [vmem:[%s3449_s4 + $0x378] sm:$0xff] }
 0x1bd   :  { %1289 = vmatprep.mubr.bf16.mxu1 %v1096_v4  ;;  %v1117_v4 = vpack.c.bf16 %v1030_v49, %v1027_v16  ;;  %v1069_v16 = vld [vmem:[%s3449_s4 + $0x398] sm:$0xff]  ;;  %v1072_v49 = vld [vmem:[%s3449_s4 + $0x3b0] sm:$0xff] }
 0x1c0   :  { %1786 = vmatmul.mubr.msk.bf16.gmra.mrb[16].mxu0 %vm1143_vm1, %v1094_v1  ;;  %v1115_v1 = vpack.c.bf16 %v1025_v3, %v1022_v0  ;;  %v1064_v0 = vld [vmem:[%s3449_s4 + $0x370] sm:$0xff]  ;;  %v1067_v3 = vld [vmem:[%s3449_s4 + $0x388] sm:$0xff] }
 0x1c1   :  { %1532 = vmatprep.mubr.bf16.mxu0 %v2058_v57 }
 0x1c4   :  { %1290 = vmatmul.mubr.bf16.gmra.mrb[20].mxu1 %v1095_v9  ;;  %v1116_v9 = vpack.c.bf16 %v1029_v5, %v1026_v2  ;;  %v1068_v2 = vld [vmem:[%s3449_s4 + $0x390] sm:$0xff]  ;;  %v1071_v5 = vld [vmem:[%s3449_s4 + $0x3a8] sm:$0xff] }
 0x1c5   :  { %1299 = vmatprep.mubr.bf16.mxu1 %v1099_v19  ;;  %v1120_v19 = vpack.c.bf16 %v1036_v14, %v1033_v13  ;;  %v1075_v13 = vld [vmem:[%s3449_s4 + $0x3c8] sm:$0xff]  ;;  %v1078_v14 = vld [vmem:[%s3449_s4 + $0x3e0] sm:$0xff] }
 0x1c8   :  { %1787 = vmatmul.mubr.msk.bf16.gmra.mrb[20].mxu0 %vm1143_vm1, %v1097_v20  ;;  %v1118_v20 = vpack.c.bf16 %v1031_v18, %v1028_v17  ;;  %v1070_v17 = vld [vmem:[%s3449_s4 + $0x3a0] sm:$0xff]  ;;  %v1073_v18 = vld [vmem:[%s3449_s4 + $0x3b8] sm:$0xff] }
 0x1c9   :  { %1542 = vmatprep.mubr.bf16.mxu0 %v2058_v57 }
 0x1cc   :  { %1300 = vmatmul.mubr.bf16.gmra.mrb[24].mxu1 %v1098_v26  ;;  %v1119_v26 = vpack.c.bf16 %v1035_v23, %v1032_v22  ;;  %v1074_v22 = vld [vmem:[%s3449_s4 + $0x3c0] sm:$0xff]  ;;  %v1077_v23 = vld [vmem:[%s3449_s4 + $0x3d8] sm:$0xff] }
 0x1cd   :  { %1309 = vmatprep.mubr.bf16.mxu1 %v1102_v29  ;;  %v1123_v29 = vpack.c.bf16 %v1042_v25, %v1039_v24  ;;  %v1140_v24 = vpack.c.bf16 %v1077_v23, %v1074_v22  ;;  %v1076_v25 = vld [vmem:[%s3449_s4 + $0x3d0] sm:$0xff] }
 0x1d0   :  { %1788 = vmatmul.mubr.msk.bf16.gmra.mrb[24].mxu0 %vm1143_vm1, %v1100_v30  ;;  %v1121_v30 = vpack.c.bf16 %v1037_v28, %v1034_v27 }
 0x1d1   :  { %1552 = vmatprep.mubr.bf16.mxu0 %v2058_v57 }
 0x1d4   :  { %1310 = vmatmul.mubr.bf16.gmra.mrb[28].mxu1 %v1101_v34  ;;  %v1122_v34 = vpack.c.bf16 %v1041_v32, %v1038_v31 }
 0x1d5   :  { %1319 = vmatprep.mubr.bf16.mxu1 %v1105_v37  ;;  %v1126_v37 = vpack.c.bf16 %v1048_v21, %v1045_v33 }
 0x1d8   :  { %1789 = vmatmul.mubr.msk.bf16.gmra.mrb[28].mxu0 %vm1143_vm1, %v1103_v38  ;;  %v1124_v38 = vpack.c.bf16 %v1043_v36, %v1040_v35 }
 0x1d9   :  { %1562 = vmatprep.mubr.bf16.mxu0 %v2058_v57 }
 0x1dc   :  { %1320 = vmatmul.mubr.bf16.gmra.mrb[32].mxu1 %v1104_v43  ;;  %v1125_v43 = vpack.c.bf16 %v1047_v40, %v1044_v39 }
 0x1dd   :  { %1329 = vmatprep.mubr.bf16.mxu1 %v1108_v46  ;;  %v1129_v46 = vpack.c.bf16 %v1054_v42, %v1051_v41 }
 0x1e0   :  { %1790 = vmatmul.mubr.msk.bf16.gmra.mrb[32].mxu0 %vm1143_vm1, %v1106_v47  ;;  %v1127_v47 = vpack.c.bf16 %v1049_v45, %v1046_v44 }
 0x1e1   :  { %1572 = vmatprep.mubr.bf16.mxu0 %v2058_v57 }
 0x1e4   :  { %1330 = vmatmul.mubr.bf16.gmra.mrb[36].mxu1 %v1107_v54  ;;  %v1128_v54 = vpack.c.bf16 %v1053_v51, %v1050_v48 }
 0x1e5   :  { %1339 = vmatprep.mubr.bf16.mxu1 %v1111_v58  ;;  %v1132_v58 = vpack.c.bf16 %v1060_v53, %v1057_v52 }
 0x1e8   :  { %1791 = vmatmul.mubr.msk.bf16.gmra.mrb[36].mxu0 %vm1143_vm1, %v1109_v59  ;;  %v1130_v59 = vpack.c.bf16 %v1055_v56, %v1052_v55 }
 0x1e9   :  { %1582 = vmatprep.mubr.bf16.mxu0 %v2058_v57 }
 0x1ec   :  { %1340 = vmatmul.mubr.bf16.gmra.mrb[40].mxu1 %v1110_v6  ;;  %v1131_v6 = vpack.c.bf16 %v1059_v61, %v1056_v60 }
 0x1ed   :  { %1349 = vmatprep.mubr.bf16.mxu1 %v1114_v10  ;;  %v1135_v10 = vpack.c.bf16 %v1066_v63, %v1063_v62 }
 0x1f0   :  { %1792 = vmatmul.mubr.msk.bf16.gmra.mrb[40].mxu0 %vm1143_vm1, %v1112_v11  ;;  %v1133_v11 = vpack.c.bf16 %v1061_v8, %v1058_v7 }
 0x1f1   :  { %1592 = vmatprep.mubr.bf16.mxu0 %v2058_v57 }
 0x1f4   :  { %1350 = vmatmul.mubr.bf16.gmra.mrb[44].mxu1 %v1113_v50  ;;  %v1134_v50 = vpack.c.bf16 %v1065_v12, %v1062_v15 }
 0x1f5   :  { %1359 = vmatprep.mubr.bf16.mxu1 %v1117_v4  ;;  %v1138_v4 = vpack.c.bf16 %v1072_v49, %v1069_v16 }
 0x1f8   :  { %1793 = vmatmul.mubr.msk.bf16.gmra.mrb[44].mxu0 %vm1143_vm1, %v1115_v1  ;;  %v1136_v1 = vpack.c.bf16 %v1067_v3, %v1064_v0 }
 0x1f9   :  { %1602 = vmatprep.mubr.bf16.mxu0 %v2058_v57 }
 0x1fc   :  { %1360 = vmatmul.mubr.bf16.gmra.mrb[48].mxu1 %v1116_v9  ;;  %v1137_v9 = vpack.c.bf16 %v1071_v5, %v1068_v2 }
 0x1fd   :  { %1369 = vmatprep.mubr.bf16.mxu1 %v1120_v19  ;;  %v1141_v19 = vpack.c.bf16 %v1078_v14, %v1075_v13 }
 0x200   :  { %1794 = vmatmul.mubr.msk.bf16.gmra.mrb[48].mxu0 %vm1143_vm1, %v1118_v20  ;;  %v1139_v20 = vpack.c.bf16 %v1073_v18, %v1070_v17 }
 0x201   :  { %1612 = vmatprep.mubr.bf16.mxu0 %v2058_v57 }
 0x204   :  { %1370 = vmatmul.mubr.bf16.gmra.mrb[52].mxu1 %v1119_v26  ;;  %v1079_v26 = vld [vmem:[%s3449_s4 + $0x3e8] sm:$0xff] }
 0x205   :  { %1379 = vmatprep.mubr.bf16.mxu1 %v1123_v29  ;;  %v1142_v27 = vpack.c.bf16 %v1079_v26, %v1076_v25 }
 0x208   :  { %1795 = vmatmul.mubr.msk.bf16.gmra.mrb[52].mxu0 %vm1143_vm1, %v1121_v30 }
 0x209   :  { %1622 = vmatprep.mubr.bf16.mxu0 %v2058_v57 }
 0x20c   :  { %1380 = vmatmul.mubr.bf16.gmra.mrb[56].mxu1 %v1122_v34 }
 0x20d   :  { %1389 = vmatprep.mubr.bf16.mxu1 %v1126_v37 }
 0x210   :  { %1796 = vmatmul.mubr.msk.bf16.gmra.mrb[56].mxu0 %vm1143_vm1, %v1124_v38 }
 0x211   :  { %1632 = vmatprep.mubr.bf16.mxu0 %v2058_v57 }
 0x214   :  { %1390 = vmatmul.mubr.bf16.gmra.mrb[60].mxu1 %v1125_v43 }
 0x215   :  { %1399 = vmatprep.mubr.bf16.mxu1 %v1129_v46 }
 0x218   :  { %1797 = vmatmul.mubr.msk.bf16.gmra.mrb[60].mxu0 %vm1143_vm1, %v1127_v47 }
 0x219   :  { %1642 = vmatprep.mubr.bf16.mxu0 %v2058_v57 }
 0x21c   :  { %1400 = vmatmul.mubr.bf16.gmra.mrb[64].mxu1 %v1128_v54 }
 0x21d   :  { %1409 = vmatprep.mubr.bf16.mxu1 %v1132_v58 }
 0x220   :  { %1798 = vmatmul.mubr.msk.bf16.gmra.mrb[64].mxu0 %vm1143_vm1, %v1130_v59 }
 0x221   :  { %1652 = vmatprep.mubr.bf16.mxu0 %v2058_v57 }
 0x224   :  { %1410 = vmatmul.mubr.bf16.gmra.mrb[68].mxu1 %v1131_v6 }
 0x225   :  { %1419 = vmatprep.mubr.bf16.mxu1 %v1135_v10 }
 0x228   :  { %1799 = vmatmul.mubr.msk.bf16.gmra.mrb[68].mxu0 %vm1143_vm1, %v1133_v11 }
 0x229   :  { %1662 = vmatprep.mubr.bf16.mxu0 %v2058_v57 }
 0x22c   :  { %1420 = vmatmul.mubr.bf16.gmra.mrb[72].mxu1 %v1134_v50 }
 0x22d   :  { %1429 = vmatprep.mubr.bf16.mxu1 %v1138_v4 }
 0x230   :  { %1800 = vmatmul.mubr.msk.bf16.gmra.mrb[72].mxu0 %vm1143_vm1, %v1136_v1 }
 0x231   :  { %1672 = vmatprep.mubr.bf16.mxu0 %v2058_v57 }
 0x234   :  { %1430 = vmatmul.mubr.bf16.gmra.mrb[76].mxu1 %v1137_v9 }
 0x235   :  { %1439 = vmatprep.mubr.bf16.mxu1 %v1141_v19 }
 0x238   :  { %1801 = vmatmul.mubr.msk.bf16.gmra.mrb[76].mxu0 %vm1143_vm1, %v1139_v20 }
 0x239   :  { %1682 = vmatprep.mubr.bf16.mxu0 %v2058_v57 }
 0x23c   :  { %1440 = vmatmul.mubr.bf16.gmra.mrb[80].mxu1 %v1140_v24 }
 0x240   :  { %1802 = vmatmul.mubr.msk.bf16.gmra.mrb[80].mxu0 %vm1143_vm1, %v1142_v27 }
 0x26f   :  { %v1241_v28 = vpop.f32.mrb[0].mxu1 }
 0x270   :  { %v1243_v29 = vpop.f32.mrb[1].mxu1 }
 0x271   :  { %v1245_v30 = vpop.f32.mrb[2].mxu1 }
 0x272   :  { %v1247_v31 = vpop.f32.mrb[3].mxu1 }
 0x273   :  { %v1484_v32 = vpop.f32.mrb[0].mxu0 }
 0x274   :  { %v1485_v33 = vadd.f32 %v1484_v32, %v1241_v28  ;;  %v1486_v21 = vpop.f32.mrb[1].mxu0 }
 0x275   :  { %v1487_v57 = vadd.f32 %v1486_v21, %v1243_v29  ;;  %v1488_v34 = vpop.f32.mrb[2].mxu0 }
 0x276   :  { %1693 = vst [vmem:[%s3451_s5] sm:$0xff] %v1485_v33  ;;  %v1489_v35 = vadd.f32 %v1488_v34, %v1245_v30  ;;  %v1490_v36 = vpop.f32.mrb[3].mxu0 }
 0x277   :  { %1695 = vst.msk [vmem:[%s3451_s5 + $0x8] sm:$0xff] %vm1694_vm2, %v1487_v57  ;;  %v1491_v37 = vadd.f32 %v1490_v36, %v1247_v31  ;;  %v1251_v38 = vpop.f32.mrb[4].mxu1 }
 0x278   :  { %1696 = vst [vmem:[%s3451_s5 + $0x10] sm:$0xff] %v1489_v35  ;;  %v1253_v39 = vpop.f32.mrb[5].mxu1 }
 0x279   :  { %1697 = vst.msk [vmem:[%s3451_s5 + $0x18] sm:$0xff] %vm1694_vm2, %v1491_v37  ;;  %v1255_v40 = vpop.f32.mrb[6].mxu1 }
 0x27a   :  { %v1257_v41 = vpop.f32.mrb[7].mxu1 }
 0x27b   :  { %v1494_v42 = vpop.f32.mrb[4].mxu0 }
 0x27c   :  { %v1495_v43 = vadd.f32 %v1494_v42, %v1251_v38  ;;  %v1496_v44 = vpop.f32.mrb[5].mxu0 }
 0x27d   :  { %v1497_v45 = vadd.f32 %v1496_v44, %v1253_v39  ;;  %v1498_v46 = vpop.f32.mrb[6].mxu0 }
 0x27e   :  { %1698 = vst [vmem:[%s3451_s5 + $0x20] sm:$0xff] %v1495_v43  ;;  %v1499_v47 = vadd.f32 %v1498_v46, %v1255_v40  ;;  %v1500_v48 = vpop.f32.mrb[7].mxu0 }
 0x27f   :  { %1699 = vst.msk [vmem:[%s3451_s5 + $0x28] sm:$0xff] %vm1694_vm2, %v1497_v45  ;;  %v1501_v51 = vadd.f32 %v1500_v48, %v1257_v41  ;;  %v1261_v52 = vpop.f32.mrb[8].mxu1 }
 0x280   :  { %1700 = vst [vmem:[%s3451_s5 + $0x30] sm:$0xff] %v1499_v47  ;;  %v1263_v53 = vpop.f32.mrb[9].mxu1 }
 0x281   :  { %1701 = vst.msk [vmem:[%s3451_s5 + $0x38] sm:$0xff] %vm1694_vm2, %v1501_v51  ;;  %v1265_v54 = vpop.f32.mrb[10].mxu1 }
 0x282   :  { %v1267_v55 = vpop.f32.mrb[11].mxu1 }
 0x283   :  { %v1504_v56 = vpop.f32.mrb[8].mxu0 }
 0x284   :  { %v1505_v58 = vadd.f32 %v1504_v56, %v1261_v52  ;;  %v1506_v59 = vpop.f32.mrb[9].mxu0 }
 0x285   :  { %v1507_v60 = vadd.f32 %v1506_v59, %v1263_v53  ;;  %v1508_v61 = vpop.f32.mrb[10].mxu0 }
 0x286   :  { %1702 = vst [vmem:[%s3451_s5 + $0x40] sm:$0xff] %v1505_v58  ;;  %v1509_v62 = vadd.f32 %v1508_v61, %v1265_v54  ;;  %v1510_v63 = vpop.f32.mrb[11].mxu0 }
 0x287   :  { %1703 = vst.msk [vmem:[%s3451_s5 + $0x48] sm:$0xff] %vm1694_vm2, %v1507_v60  ;;  %v1511_v6 = vadd.f32 %v1510_v63, %v1267_v55  ;;  %v1271_v7 = vpop.f32.mrb[12].mxu1 }
 0x288   :  { %1704 = vst [vmem:[%s3451_s5 + $0x50] sm:$0xff] %v1509_v62  ;;  %v1273_v8 = vpop.f32.mrb[13].mxu1 }
 0x289   :  { %1705 = vst.msk [vmem:[%s3451_s5 + $0x58] sm:$0xff] %vm1694_vm2, %v1511_v6  ;;  %v1275_v10 = vpop.f32.mrb[14].mxu1 }
 0x28a   :  { %v1277_v11 = vpop.f32.mrb[15].mxu1 }
 0x28b   :  { %v1514_v15 = vpop.f32.mrb[12].mxu0 }
 0x28c   :  { %v1515_v12 = vadd.f32 %v1514_v15, %v1271_v7  ;;  %v1516_v16 = vpop.f32.mrb[13].mxu0 }
 0x28d   :  { %v1517_v49 = vadd.f32 %v1516_v16, %v1273_v8  ;;  %v1518_v50 = vpop.f32.mrb[14].mxu0 }
 0x28e   :  { %1706 = vst [vmem:[%s3451_s5 + $0x60] sm:$0xff] %v1515_v12  ;;  %v1519_v0 = vadd.f32 %v1518_v50, %v1275_v10  ;;  %v1520_v3 = vpop.f32.mrb[15].mxu0 }
 0x28f   :  { %1707 = vst.msk [vmem:[%s3451_s5 + $0x68] sm:$0xff] %vm1694_vm2, %v1517_v49  ;;  %v1521_v4 = vadd.f32 %v1520_v3, %v1277_v11  ;;  %v1281_v1 = vpop.f32.mrb[16].mxu1 }
 0x290   :  { %1708 = vst [vmem:[%s3451_s5 + $0x70] sm:$0xff] %v1519_v0  ;;  %v1283_v2 = vpop.f32.mrb[17].mxu1 }
 0x291   :  { %1709 = vst.msk [vmem:[%s3451_s5 + $0x78] sm:$0xff] %vm1694_vm2, %v1521_v4  ;;  %v1285_v5 = vpop.f32.mrb[18].mxu1 }
 0x292   :  { %v1287_v13 = vpop.f32.mrb[19].mxu1 }
 0x293   :  { %v1524_v14 = vpop.f32.mrb[16].mxu0 }
 0x294   :  { %v1525_v9 = vadd.f32 %v1524_v14, %v1281_v1  ;;  %v1526_v17 = vpop.f32.mrb[17].mxu0 }
 0x295   :  { %v1527_v18 = vadd.f32 %v1526_v17, %v1283_v2  ;;  %v1528_v19 = vpop.f32.mrb[18].mxu0 }
 0x296   :  { %1710 = vst [vmem:[%s3451_s5 + $0x80] sm:$0xff] %v1525_v9  ;;  %v1529_v20 = vadd.f32 %v1528_v19, %v1285_v5  ;;  %v1530_v22 = vpop.f32.mrb[19].mxu0 }
 0x297   :  { %1711 = vst.msk [vmem:[%s3451_s5 + $0x88] sm:$0xff] %vm1694_vm2, %v1527_v18  ;;  %v1531_v23 = vadd.f32 %v1530_v22, %v1287_v13  ;;  %v1291_v24 = vpop.f32.mrb[20].mxu1 }
 0x298   :  { %1712 = vst [vmem:[%s3451_s5 + $0x90] sm:$0xff] %v1529_v20  ;;  %v1293_v25 = vpop.f32.mrb[21].mxu1 }
 0x299   :  { %1713 = vst.msk [vmem:[%s3451_s5 + $0x98] sm:$0xff] %vm1694_vm2, %v1531_v23  ;;  %v1295_v26 = vpop.f32.mrb[22].mxu1 }
 0x29a   :  { %v1297_v27 = vpop.f32.mrb[23].mxu1 }
 0x29b   :  { %v1534_v28 = vpop.f32.mrb[20].mxu0 }
 0x29c   :  { %v1535_v29 = vadd.f32 %v1534_v28, %v1291_v24  ;;  %v1536_v30 = vpop.f32.mrb[21].mxu0 }
 0x29d   :  { %v1537_v31 = vadd.f32 %v1536_v30, %v1293_v25  ;;  %v1538_v32 = vpop.f32.mrb[22].mxu0 }
 0x29e   :  { %1714 = vst [vmem:[%s3451_s5 + $0xa0] sm:$0xff] %v1535_v29  ;;  %v1539_v33 = vadd.f32 %v1538_v32, %v1295_v26  ;;  %v1540_v21 = vpop.f32.mrb[23].mxu0 }
 0x29f   :  { %1715 = vst.msk [vmem:[%s3451_s5 + $0xa8] sm:$0xff] %vm1694_vm2, %v1537_v31  ;;  %v1541_v57 = vadd.f32 %v1540_v21, %v1297_v27  ;;  %v1301_v34 = vpop.f32.mrb[24].mxu1 }
 0x2a0   :  { %1716 = vst [vmem:[%s3451_s5 + $0xb0] sm:$0xff] %v1539_v33  ;;  %v1303_v35 = vpop.f32.mrb[25].mxu1 }
 0x2a1   :  { %1717 = vst.msk [vmem:[%s3451_s5 + $0xb8] sm:$0xff] %vm1694_vm2, %v1541_v57  ;;  %v1305_v36 = vpop.f32.mrb[26].mxu1 }
 0x2a2   :  { %v1307_v37 = vpop.f32.mrb[27].mxu1 }
 0x2a3   :  { %v1544_v38 = vpop.f32.mrb[24].mxu0 }
 0x2a4   :  { %v1545_v39 = vadd.f32 %v1544_v38, %v1301_v34  ;;  %v1546_v40 = vpop.f32.mrb[25].mxu0 }
 0x2a5   :  { %v1547_v41 = vadd.f32 %v1546_v40, %v1303_v35  ;;  %v1548_v42 = vpop.f32.mrb[26].mxu0 }
 0x2a6   :  { %1718 = vst [vmem:[%s3451_s5 + $0xc0] sm:$0xff] %v1545_v39  ;;  %v1549_v43 = vadd.f32 %v1548_v42, %v1305_v36  ;;  %v1550_v44 = vpop.f32.mrb[27].mxu0 }
 0x2a7   :  { %1719 = vst.msk [vmem:[%s3451_s5 + $0xc8] sm:$0xff] %vm1694_vm2, %v1547_v41  ;;  %v1551_v45 = vadd.f32 %v1550_v44, %v1307_v37  ;;  %v1311_v46 = vpop.f32.mrb[28].mxu1 }
 0x2a8   :  { %1720 = vst [vmem:[%s3451_s5 + $0xd0] sm:$0xff] %v1549_v43  ;;  %v1313_v47 = vpop.f32.mrb[29].mxu1 }
 0x2a9   :  { %1721 = vst.msk [vmem:[%s3451_s5 + $0xd8] sm:$0xff] %vm1694_vm2, %v1551_v45  ;;  %v1315_v48 = vpop.f32.mrb[30].mxu1 }
 0x2aa   :  { %v1317_v51 = vpop.f32.mrb[31].mxu1 }
 0x2ab   :  { %v1554_v52 = vpop.f32.mrb[28].mxu0 }
 0x2ac   :  { %v1555_v53 = vadd.f32 %v1554_v52, %v1311_v46  ;;  %v1556_v54 = vpop.f32.mrb[29].mxu0 }
 0x2ad   :  { %v1557_v55 = vadd.f32 %v1556_v54, %v1313_v47  ;;  %v1558_v56 = vpop.f32.mrb[30].mxu0 }
 0x2ae   :  { %1722 = vst [vmem:[%s3451_s5 + $0xe0] sm:$0xff] %v1555_v53  ;;  %v1559_v58 = vadd.f32 %v1558_v56, %v1315_v48  ;;  %v1560_v59 = vpop.f32.mrb[31].mxu0 }
 0x2af   :  { %1723 = vst.msk [vmem:[%s3451_s5 + $0xe8] sm:$0xff] %vm1694_vm2, %v1557_v55  ;;  %v1561_v60 = vadd.f32 %v1560_v59, %v1317_v51  ;;  %v1321_v61 = vpop.f32.mrb[32].mxu1 }
 0x2b0   :  { %1724 = vst [vmem:[%s3451_s5 + $0xf0] sm:$0xff] %v1559_v58  ;;  %v1323_v62 = vpop.f32.mrb[33].mxu1 }
 0x2b1   :  { %1725 = vst.msk [vmem:[%s3451_s5 + $0xf8] sm:$0xff] %vm1694_vm2, %v1561_v60  ;;  %v1325_v63 = vpop.f32.mrb[34].mxu1 }
 0x2b2   :  { %v1327_v6 = vpop.f32.mrb[35].mxu1 }
 0x2b3   :  { %v1564_v7 = vpop.f32.mrb[32].mxu0 }
 0x2b4   :  { %v1565_v8 = vadd.f32 %v1564_v7, %v1321_v61  ;;  %v1566_v10 = vpop.f32.mrb[33].mxu0 }
 0x2b5   :  { %v1567_v11 = vadd.f32 %v1566_v10, %v1323_v62  ;;  %v1568_v15 = vpop.f32.mrb[34].mxu0 }
 0x2b6   :  { %1726 = vst [vmem:[%s3451_s5 + $0x100] sm:$0xff] %v1565_v8  ;;  %v1569_v12 = vadd.f32 %v1568_v15, %v1325_v63  ;;  %v1570_v16 = vpop.f32.mrb[35].mxu0 }
 0x2b7   :  { %1727 = vst.msk [vmem:[%s3451_s5 + $0x108] sm:$0xff] %vm1694_vm2, %v1567_v11  ;;  %v1571_v49 = vadd.f32 %v1570_v16, %v1327_v6  ;;  %v1331_v50 = vpop.f32.mrb[36].mxu1 }
 0x2b8   :  { %1728 = vst [vmem:[%s3451_s5 + $0x110] sm:$0xff] %v1569_v12  ;;  %v1333_v0 = vpop.f32.mrb[37].mxu1 }
 0x2b9   :  { %1729 = vst.msk [vmem:[%s3451_s5 + $0x118] sm:$0xff] %vm1694_vm2, %v1571_v49  ;;  %v1335_v3 = vpop.f32.mrb[38].mxu1 }
 0x2ba   :  { %v1337_v4 = vpop.f32.mrb[39].mxu1 }
 0x2bb   :  { %v1574_v1 = vpop.f32.mrb[36].mxu0 }
 0x2bc   :  { %v1575_v2 = vadd.f32 %v1574_v1, %v1331_v50  ;;  %v1576_v5 = vpop.f32.mrb[37].mxu0 }
 0x2bd   :  { %v1577_v13 = vadd.f32 %v1576_v5, %v1333_v0  ;;  %v1578_v14 = vpop.f32.mrb[38].mxu0 }
 0x2be   :  { %1730 = vst [vmem:[%s3451_s5 + $0x120] sm:$0xff] %v1575_v2  ;;  %v1579_v9 = vadd.f32 %v1578_v14, %v1335_v3  ;;  %v1580_v17 = vpop.f32.mrb[39].mxu0 }
 0x2bf   :  { %1731 = vst.msk [vmem:[%s3451_s5 + $0x128] sm:$0xff] %vm1694_vm2, %v1577_v13  ;;  %v1581_v18 = vadd.f32 %v1580_v17, %v1337_v4  ;;  %v1341_v19 = vpop.f32.mrb[40].mxu1 }
 0x2c0   :  { %1732 = vst [vmem:[%s3451_s5 + $0x130] sm:$0xff] %v1579_v9  ;;  %v1343_v20 = vpop.f32.mrb[41].mxu1 }
 0x2c1   :  { %1733 = vst.msk [vmem:[%s3451_s5 + $0x138] sm:$0xff] %vm1694_vm2, %v1581_v18  ;;  %v1345_v22 = vpop.f32.mrb[42].mxu1 }
 0x2c2   :  { %v1347_v23 = vpop.f32.mrb[43].mxu1 }
 0x2c3   :  { %v1584_v24 = vpop.f32.mrb[40].mxu0 }
 0x2c4   :  { %v1585_v25 = vadd.f32 %v1584_v24, %v1341_v19  ;;  %v1586_v26 = vpop.f32.mrb[41].mxu0 }
 0x2c5   :  { %v1587_v27 = vadd.f32 %v1586_v26, %v1343_v20  ;;  %v1588_v28 = vpop.f32.mrb[42].mxu0 }
 0x2c6   :  { %1734 = vst [vmem:[%s3451_s5 + $0x140] sm:$0xff] %v1585_v25  ;;  %v1589_v29 = vadd.f32 %v1588_v28, %v1345_v22  ;;  %v1590_v30 = vpop.f32.mrb[43].mxu0 }
 0x2c7   :  { %1735 = vst.msk [vmem:[%s3451_s5 + $0x148] sm:$0xff] %vm1694_vm2, %v1587_v27  ;;  %v1591_v31 = vadd.f32 %v1590_v30, %v1347_v23  ;;  %v1351_v32 = vpop.f32.mrb[44].mxu1 }
 0x2c8   :  { %1736 = vst [vmem:[%s3451_s5 + $0x150] sm:$0xff] %v1589_v29  ;;  %v1353_v33 = vpop.f32.mrb[45].mxu1 }
 0x2c9   :  { %1737 = vst.msk [vmem:[%s3451_s5 + $0x158] sm:$0xff] %vm1694_vm2, %v1591_v31  ;;  %v1355_v21 = vpop.f32.mrb[46].mxu1 }
 0x2ca   :  { %v1357_v57 = vpop.f32.mrb[47].mxu1 }
 0x2cb   :  { %v1594_v34 = vpop.f32.mrb[44].mxu0 }
 0x2cc   :  { %v1595_v35 = vadd.f32 %v1594_v34, %v1351_v32  ;;  %v1596_v36 = vpop.f32.mrb[45].mxu0 }
 0x2cd   :  { %v1597_v37 = vadd.f32 %v1596_v36, %v1353_v33  ;;  %v1598_v38 = vpop.f32.mrb[46].mxu0 }
 0x2ce   :  { %1738 = vst [vmem:[%s3451_s5 + $0x160] sm:$0xff] %v1595_v35  ;;  %v1599_v39 = vadd.f32 %v1598_v38, %v1355_v21  ;;  %v1600_v40 = vpop.f32.mrb[47].mxu0 }
 0x2cf   :  { %1739 = vst.msk [vmem:[%s3451_s5 + $0x168] sm:$0xff] %vm1694_vm2, %v1597_v37  ;;  %v1601_v41 = vadd.f32 %v1600_v40, %v1357_v57  ;;  %v1361_v42 = vpop.f32.mrb[48].mxu1 }
 0x2d0   :  { %1740 = vst [vmem:[%s3451_s5 + $0x170] sm:$0xff] %v1599_v39  ;;  %v1363_v43 = vpop.f32.mrb[49].mxu1 }
 0x2d1   :  { %1741 = vst.msk [vmem:[%s3451_s5 + $0x178] sm:$0xff] %vm1694_vm2, %v1601_v41  ;;  %v1365_v44 = vpop.f32.mrb[50].mxu1 }
 0x2d2   :  { %v1367_v45 = vpop.f32.mrb[51].mxu1 }
 0x2d3   :  { %v1604_v46 = vpop.f32.mrb[48].mxu0 }
 0x2d4   :  { %v1605_v47 = vadd.f32 %v1604_v46, %v1361_v42  ;;  %v1606_v48 = vpop.f32.mrb[49].mxu0 }
 0x2d5   :  { %v1607_v51 = vadd.f32 %v1606_v48, %v1363_v43  ;;  %v1608_v52 = vpop.f32.mrb[50].mxu0 }
 0x2d6   :  { %1742 = vst [vmem:[%s3451_s5 + $0x180] sm:$0xff] %v1605_v47  ;;  %v1609_v53 = vadd.f32 %v1608_v52, %v1365_v44  ;;  %v1610_v54 = vpop.f32.mrb[51].mxu0 }
 0x2d7   :  { %1743 = vst.msk [vmem:[%s3451_s5 + $0x188] sm:$0xff] %vm1694_vm2, %v1607_v51  ;;  %v1611_v55 = vadd.f32 %v1610_v54, %v1367_v45  ;;  %v1371_v56 = vpop.f32.mrb[52].mxu1 }
 0x2d8   :  { %1744 = vst [vmem:[%s3451_s5 + $0x190] sm:$0xff] %v1609_v53  ;;  %v1373_v58 = vpop.f32.mrb[53].mxu1 }
 0x2d9   :  { %1745 = vst.msk [vmem:[%s3451_s5 + $0x198] sm:$0xff] %vm1694_vm2, %v1611_v55  ;;  %v1375_v59 = vpop.f32.mrb[54].mxu1 }
 0x2da   :  { %v1377_v60 = vpop.f32.mrb[55].mxu1 }
 0x2db   :  { %v1614_v61 = vpop.f32.mrb[52].mxu0 }
 0x2dc   :  { %v1615_v62 = vadd.f32 %v1614_v61, %v1371_v56  ;;  %v1616_v63 = vpop.f32.mrb[53].mxu0 }
 0x2dd   :  { %v1617_v6 = vadd.f32 %v1616_v63, %v1373_v58  ;;  %v1618_v7 = vpop.f32.mrb[54].mxu0 }
 0x2de   :  { %1746 = vst [vmem:[%s3451_s5 + $0x1a0] sm:$0xff] %v1615_v62  ;;  %v1619_v8 = vadd.f32 %v1618_v7, %v1375_v59  ;;  %v1620_v10 = vpop.f32.mrb[55].mxu0 }
 0x2df   :  { %1747 = vst.msk [vmem:[%s3451_s5 + $0x1a8] sm:$0xff] %vm1694_vm2, %v1617_v6  ;;  %v1621_v11 = vadd.f32 %v1620_v10, %v1377_v60  ;;  %v1381_v15 = vpop.f32.mrb[56].mxu1 }
 0x2e0   :  { %1748 = vst [vmem:[%s3451_s5 + $0x1b0] sm:$0xff] %v1619_v8  ;;  %v1383_v12 = vpop.f32.mrb[57].mxu1 }
 0x2e1   :  { %1749 = vst.msk [vmem:[%s3451_s5 + $0x1b8] sm:$0xff] %vm1694_vm2, %v1621_v11  ;;  %v1385_v16 = vpop.f32.mrb[58].mxu1 }
 0x2e2   :  { %v1387_v49 = vpop.f32.mrb[59].mxu1 }
 0x2e3   :  { %v1624_v50 = vpop.f32.mrb[56].mxu0 }
 0x2e4   :  { %v1625_v0 = vadd.f32 %v1624_v50, %v1381_v15  ;;  %v1626_v3 = vpop.f32.mrb[57].mxu0 }
 0x2e5   :  { %v1627_v4 = vadd.f32 %v1626_v3, %v1383_v12  ;;  %v1628_v1 = vpop.f32.mrb[58].mxu0 }
 0x2e6   :  { %1750 = vst [vmem:[%s3451_s5 + $0x1c0] sm:$0xff] %v1625_v0  ;;  %v1629_v2 = vadd.f32 %v1628_v1, %v1385_v16  ;;  %v1630_v5 = vpop.f32.mrb[59].mxu0 }
 0x2e7   :  { %1751 = vst.msk [vmem:[%s3451_s5 + $0x1c8] sm:$0xff] %vm1694_vm2, %v1627_v4  ;;  %v1631_v13 = vadd.f32 %v1630_v5, %v1387_v49  ;;  %v1391_v14 = vpop.f32.mrb[60].mxu1 }
 0x2e8   :  { %1752 = vst [vmem:[%s3451_s5 + $0x1d0] sm:$0xff] %v1629_v2  ;;  %v1393_v9 = vpop.f32.mrb[61].mxu1 }
 0x2e9   :  { %1753 = vst.msk [vmem:[%s3451_s5 + $0x1d8] sm:$0xff] %vm1694_vm2, %v1631_v13  ;;  %v1395_v17 = vpop.f32.mrb[62].mxu1 }
 0x2ea   :  { %v1397_v18 = vpop.f32.mrb[63].mxu1 }
 0x2eb   :  { %v1634_v19 = vpop.f32.mrb[60].mxu0 }
 0x2ec   :  { %v1635_v20 = vadd.f32 %v1634_v19, %v1391_v14  ;;  %v1636_v22 = vpop.f32.mrb[61].mxu0 }
 0x2ed   :  { %v1637_v23 = vadd.f32 %v1636_v22, %v1393_v9  ;;  %v1638_v24 = vpop.f32.mrb[62].mxu0 }
 0x2ee   :  { %1754 = vst [vmem:[%s3451_s5 + $0x1e0] sm:$0xff] %v1635_v20  ;;  %v1639_v25 = vadd.f32 %v1638_v24, %v1395_v17  ;;  %v1640_v26 = vpop.f32.mrb[63].mxu0 }
 0x2ef   :  { %1755 = vst.msk [vmem:[%s3451_s5 + $0x1e8] sm:$0xff] %vm1694_vm2, %v1637_v23  ;;  %v1641_v27 = vadd.f32 %v1640_v26, %v1397_v18  ;;  %v1401_v28 = vpop.f32.mrb[64].mxu1 }
 0x2f0   :  { %1756 = vst [vmem:[%s3451_s5 + $0x1f0] sm:$0xff] %v1639_v25  ;;  %v1403_v29 = vpop.f32.mrb[65].mxu1 }
 0x2f1   :  { %1757 = vst.msk [vmem:[%s3451_s5 + $0x1f8] sm:$0xff] %vm1694_vm2, %v1641_v27  ;;  %v1405_v30 = vpop.f32.mrb[66].mxu1 }
 0x2f2   :  { %v1407_v31 = vpop.f32.mrb[67].mxu1 }
 0x2f3   :  { %v1644_v32 = vpop.f32.mrb[64].mxu0 }
 0x2f4   :  { %v1645_v33 = vadd.f32 %v1644_v32, %v1401_v28  ;;  %v1646_v21 = vpop.f32.mrb[65].mxu0 }
 0x2f5   :  { %v1647_v57 = vadd.f32 %v1646_v21, %v1403_v29  ;;  %v1648_v34 = vpop.f32.mrb[66].mxu0 }
 0x2f6   :  { %1758 = vst [vmem:[%s3451_s5 + $0x200] sm:$0xff] %v1645_v33  ;;  %v1649_v35 = vadd.f32 %v1648_v34, %v1405_v30  ;;  %v1650_v36 = vpop.f32.mrb[67].mxu0 }
 0x2f7   :  { %1759 = vst.msk [vmem:[%s3451_s5 + $0x208] sm:$0xff] %vm1694_vm2, %v1647_v57  ;;  %v1651_v37 = vadd.f32 %v1650_v36, %v1407_v31  ;;  %v1411_v38 = vpop.f32.mrb[68].mxu1 }
 0x2f8   :  { %1760 = vst [vmem:[%s3451_s5 + $0x210] sm:$0xff] %v1649_v35  ;;  %v1413_v39 = vpop.f32.mrb[69].mxu1 }
 0x2f9   :  { %1761 = vst.msk [vmem:[%s3451_s5 + $0x218] sm:$0xff] %vm1694_vm2, %v1651_v37  ;;  %v1415_v40 = vpop.f32.mrb[70].mxu1 }
 0x2fa   :  { %v1417_v41 = vpop.f32.mrb[71].mxu1 }
 0x2fb   :  { %v1654_v42 = vpop.f32.mrb[68].mxu0 }
 0x2fc   :  { %v1655_v43 = vadd.f32 %v1654_v42, %v1411_v38  ;;  %v1656_v44 = vpop.f32.mrb[69].mxu0 }
 0x2fd   :  { %v1657_v45 = vadd.f32 %v1656_v44, %v1413_v39  ;;  %v1658_v46 = vpop.f32.mrb[70].mxu0 }
 0x2fe   :  { %1762 = vst [vmem:[%s3451_s5 + $0x220] sm:$0xff] %v1655_v43  ;;  %v1659_v47 = vadd.f32 %v1658_v46, %v1415_v40  ;;  %v1660_v48 = vpop.f32.mrb[71].mxu0 }
 0x2ff   :  { %1763 = vst.msk [vmem:[%s3451_s5 + $0x228] sm:$0xff] %vm1694_vm2, %v1657_v45  ;;  %v1661_v51 = vadd.f32 %v1660_v48, %v1417_v41  ;;  %v1421_v52 = vpop.f32.mrb[72].mxu1 }
 0x300   :  { %1764 = vst [vmem:[%s3451_s5 + $0x230] sm:$0xff] %v1659_v47  ;;  %v1423_v53 = vpop.f32.mrb[73].mxu1 }
 0x301   :  { %1765 = vst.msk [vmem:[%s3451_s5 + $0x238] sm:$0xff] %vm1694_vm2, %v1661_v51  ;;  %v1425_v54 = vpop.f32.mrb[74].mxu1 }
 0x302   :  { %v1427_v55 = vpop.f32.mrb[75].mxu1 }
 0x303   :  { %v1664_v56 = vpop.f32.mrb[72].mxu0 }
 0x304   :  { %v1665_v58 = vadd.f32 %v1664_v56, %v1421_v52  ;;  %v1666_v59 = vpop.f32.mrb[73].mxu0 }
 0x305   :  { %v1667_v60 = vadd.f32 %v1666_v59, %v1423_v53  ;;  %v1668_v61 = vpop.f32.mrb[74].mxu0 }
 0x306   :  { %1766 = vst [vmem:[%s3451_s5 + $0x240] sm:$0xff] %v1665_v58  ;;  %v1669_v62 = vadd.f32 %v1668_v61, %v1425_v54  ;;  %v1670_v63 = vpop.f32.mrb[75].mxu0 }
 0x307   :  { %1767 = vst.msk [vmem:[%s3451_s5 + $0x248] sm:$0xff] %vm1694_vm2, %v1667_v60  ;;  %v1671_v6 = vadd.f32 %v1670_v63, %v1427_v55  ;;  %v1431_v7 = vpop.f32.mrb[76].mxu1 }
 0x308   :  { %1768 = vst [vmem:[%s3451_s5 + $0x250] sm:$0xff] %v1669_v62  ;;  %v1433_v8 = vpop.f32.mrb[77].mxu1 }
 0x309   :  { %1769 = vst.msk [vmem:[%s3451_s5 + $0x258] sm:$0xff] %vm1694_vm2, %v1671_v6  ;;  %v1435_v10 = vpop.f32.mrb[78].mxu1 }
 0x30a   :  { %v1437_v11 = vpop.f32.mrb[79].mxu1 }
 0x30b   :  { %v1674_v15 = vpop.f32.mrb[76].mxu0 }
 0x30c   :  { %v1675_v12 = vadd.f32 %v1674_v15, %v1431_v7  ;;  %v1676_v16 = vpop.f32.mrb[77].mxu0 }
 0x30d   :  { %v1677_v49 = vadd.f32 %v1676_v16, %v1433_v8  ;;  %v1678_v50 = vpop.f32.mrb[78].mxu0 }
 0x30e   :  { %1770 = vst [vmem:[%s3451_s5 + $0x260] sm:$0xff] %v1675_v12  ;;  %v1679_v0 = vadd.f32 %v1678_v50, %v1435_v10  ;;  %v1680_v3 = vpop.f32.mrb[79].mxu0 }
 0x30f   :  { %1771 = vst.msk [vmem:[%s3451_s5 + $0x268] sm:$0xff] %vm1694_vm2, %v1677_v49  ;;  %v1681_v4 = vadd.f32 %v1680_v3, %v1437_v11  ;;  %v1441_v1 = vpop.f32.mrb[80].mxu1 }
 0x310   :  { %1772 = vst [vmem:[%s3451_s5 + $0x270] sm:$0xff] %v1679_v0  ;;  %v1443_v2 = vpop.f32.mrb[81].mxu1 }
 0x311   :  { %1773 = vst.msk [vmem:[%s3451_s5 + $0x278] sm:$0xff] %vm1694_vm2, %v1681_v4  ;;  %v1445_v5 = vpop.f32.mrb[82].mxu1 }
 0x312   :  { %v1447_v13 = vpop.f32.mrb[83].mxu1 }
 0x313   :  { %v1684_v14 = vpop.f32.mrb[80].mxu0 }
 0x314   :  { %v1685_v9 = vadd.f32 %v1684_v14, %v1441_v1  ;;  %v1686_v17 = vpop.f32.mrb[81].mxu0 }
 0x315   :  { %v1687_v18 = vadd.f32 %v1686_v17, %v1443_v2  ;;  %v1688_v19 = vpop.f32.mrb[82].mxu0 }
 0x316   :  { %1774 = vst [vmem:[%s3451_s5 + $0x280] sm:$0xff] %v1685_v9  ;;  %v1689_v20 = vadd.f32 %v1688_v19, %v1445_v5  ;;  %v1690_v22 = vpop.f32.mrb[83].mxu0 }
 0x317   :  { %1775 = vst.msk [vmem:[%s3451_s5 + $0x288] sm:$0xff] %vm1694_vm2, %v1687_v18  ;;  %v1691_v23 = vadd.f32 %v1690_v22, %v1447_v13 }
 0x318   :  { %1776 = vst [vmem:[%s3451_s5 + $0x290] sm:$0xff] %v1689_v20 }
 0x319   :  { %1777 = vst.msk [vmem:[%s3451_s5 + $0x298] sm:$0xff] %vm1694_vm2, %v1691_v23 }

</bundles_post_ra>
